<compile_context>
chip_gen: v7x
topology: tpu7x:2x2x1
jax: 0.10.0
libtpu: 0.0.40
codegen_flags: <defaults>
</compile_context>

<pallas_src>
import functools

import jax
import jax.numpy as jnp
from jax import lax
from jax.experimental import pallas as pl
from jax.experimental.pallas import tpu as pltpu


def _round_up(n, m):
    return -(-n // m) * m


def _lstm_chunk_kernel(pre_ref, whh_ref, h_out_ref, h_scr, c_scr, *, n_chains, unroll):
    """One grid step = one (t_chunk, b_block) tile of the LSTM recurrence.

    pre_ref  : (t_chunk, b_block, 4H)  precomputed x @ W_ih^T + b_ih + b_hh
    whh_ref  : (H, 4H)                 recurrent weight, (in, out) orientation, resident
    h_out_ref: (t_chunk, b_block, H)   hidden states for this tile
    h_scr/c_scr: (b_block, H) f32      state carried across time chunks
    """
    t_chunk_idx = pl.program_id(1)  # time-chunk axis (inner, sequential)

    # PyTorch nn.LSTM default: zero initial hidden / cell state per sequence.
    @pl.when(t_chunk_idx == 0)
    def _():
        h_scr[...] = jnp.zeros_like(h_scr)
        c_scr[...] = jnp.zeros_like(c_scr)

    H = whh_ref.shape[0]
    T = pre_ref.shape[0]
    b_block = h_scr.shape[0]
    b_sub = b_block // n_chains

    whh = whh_ref[...]  # (H, 4H) f32, stays resident across the loop

    # Lane mask selecting the tanh ("g") gate lanes [2H, 3H); hoisted out of the loop.
    lane = lax.broadcasted_iota(jnp.int32, (b_sub, 4 * H), 1)
    g_mask = (lane >= 2 * H) & (lane < 3 * H)

    def step(s, carry):
        hs, cs = carry
        pre_s = pre_ref[s].astype(jnp.float32)            # (b_block, 4H)
        new_h, new_c = [], []
        for ch in range(n_chains):                         # independent chains -> ILP
            lo, hi = ch * b_sub, (ch + 1) * b_sub
            gates = pre_s[lo:hi] + jnp.dot(hs[ch], whh,
                                           preferred_element_type=jnp.float32)
            # sigmoid(x) = 0.5*(tanh(x/2)+1): one full-width EUP tanh covers all 4 gates.
            pre_act = jnp.where(g_mask, gates, gates * 0.5)
            th = jnp.tanh(pre_act)
            act = jnp.where(g_mask, th, (th + 1.0) * 0.5)
            i_g = act[:, 0 * H:1 * H]
            f_g = act[:, 1 * H:2 * H]
            g_g = act[:, 2 * H:3 * H]
            o_g = act[:, 3 * H:4 * H]
            c_new = f_g * cs[ch] + i_g * g_g
            h_new = o_g * jnp.tanh(c_new)
            new_h.append(h_new)
            new_c.append(c_new)
        h_full = new_h[0] if n_chains == 1 else jnp.concatenate(new_h, axis=0)
        h_out_ref[s] = h_full.astype(h_out_ref.dtype)
        return tuple(new_h), tuple(new_c)

    h0 = h_scr[...]
    c0 = c_scr[...]
    hs0 = tuple(h0[ch * b_sub:(ch + 1) * b_sub] for ch in range(n_chains))
    cs0 = tuple(c0[ch * b_sub:(ch + 1) * b_sub] for ch in range(n_chains))
    hs_f, cs_f = lax.fori_loop(0, T, step, (hs0, cs0), unroll=unroll)
    h_scr[...] = hs_f[0] if n_chains == 1 else jnp.concatenate(hs_f, axis=0)
    c_scr[...] = cs_f[0] if n_chains == 1 else jnp.concatenate(cs_f, axis=0)


@functools.partial(jax.jit,
                   static_argnames=("t_chunk", "b_block", "n_chains", "stream_dtype"))
def decoder_forward(x, w_ih, w_hh, b_ih, b_hh, w_out, b_out, *,
                    t_chunk=64, b_block=None, n_chains=2,
                    stream_dtype=jnp.float32):
    """x: (B, S, input_dim) batch-first, like the PyTorch module.

    Params in PyTorch layout: w_ih (4H, D_in), w_hh (4H, H), b_ih/b_hh (4H,),
    w_out (out_dim, H), b_out (out_dim,).
    """
    B, S, _ = x.shape
    H = w_hh.shape[1]
    prec = (lax.Precision.HIGHEST if stream_dtype == jnp.float32
            else lax.Precision.DEFAULT)

    # ---- Batch block / chain sizing (each chain is an 8-row f32 sublane granule). ----
    granule = 8 * n_chains
    if b_block is None:
        b_block = min(_round_up(128, granule), _round_up(B, granule))
    else:
        b_block = _round_up(b_block, granule)
    B_pad = _round_up(B, b_block)

    # ---- Time-chunk sizing against a conservative VMEM budget (v7x has 64 MiB). ----
    t_chunk_eff = max(1, min(t_chunk, _round_up(S, 8)))
    stream_bytes = jnp.dtype(stream_dtype).itemsize

    def _vmem_bytes(tc):
        pre_t = tc * b_block * 4 * H * stream_bytes
        out_t = tc * b_block * H * stream_bytes
        whh_b = H * 4 * H * 4
        scr = 2 * b_block * H * 4
        return 2 * (pre_t + out_t + whh_b) + scr          # double-buffered tiles

    vmem_budget = 40 * 1024 * 1024
    while t_chunk_eff > 8 and _vmem_bytes(t_chunk_eff) > vmem_budget:
        t_chunk_eff //= 2
    S_pad = _round_up(S, t_chunk_eff)
    unroll = int(min(t_chunk_eff, 8))                     # partial unroll inside kernel

    # ---- Hoisted input projection producing pre-gates directly in (S, B, 4H). ----
    # Pad x (narrow, D_in lanes) BEFORE projecting so no pad/transpose pass ever
    # touches the large (S, B, 4H) intermediate.
    x_pad = jnp.pad(x.astype(jnp.float32), ((0, B_pad - B), (0, S_pad - S), (0, 0)))
    bias = (b_ih + b_hh).astype(jnp.float32)
    pre_tm = jnp.einsum("bsd,gd->sbg", x_pad.astype(stream_dtype),
                        w_ih.astype(stream_dtype),
                        precision=prec, preferred_element_type=jnp.float32)
    pre_tm = (pre_tm + bias).astype(stream_dtype)          # (S_pad, B_pad, 4H)

    whh_t = jnp.transpose(w_hh.astype(jnp.float32))        # (H, 4H), resident in kernel

    grid = (B_pad // b_block, S_pad // t_chunk_eff)
    kernel = functools.partial(_lstm_chunk_kernel, n_chains=n_chains, unroll=unroll)

    h_tm = pl.pallas_call(
        kernel,
        out_shape=jax.ShapeDtypeStruct((S_pad, B_pad, H), stream_dtype),
        grid_spec=pltpu.PrefetchScalarGridSpec(
            num_scalar_prefetch=0,
            grid=grid,
            in_specs=[
                # Pre-gates tile: lane-dense (4H) last dim, streamed per chunk.
                pl.BlockSpec((t_chunk_eff, b_block, 4 * H), lambda b, t: (t, b, 0)),
                # Recurrent weight: constant index map, stays resident.
                pl.BlockSpec((H, 4 * H), lambda b, t: (0, 0)),
            ],
            out_specs=pl.BlockSpec((t_chunk_eff, b_block, H), lambda b, t: (t, b, 0)),
            scratch_shapes=[
                pltpu.VMEM((b_block, H), jnp.float32),     # h state (per batch block)
                pltpu.VMEM((b_block, H), jnp.float32),     # c state (per batch block)
            ],
        ),
        compiler_params=pltpu.CompilerParams(
            # Batch blocks are independent (megacore-shardable on v7x);
            # the time-chunk axis is the serial recurrence.
            dimension_semantics=("parallel", "arbitrary"),
            vmem_limit_bytes=48 * 1024 * 1024,
        ),
    )(pre_tm, whh_t)

    # ---- Hoisted output projection; the transpose is folded into the einsum. ----
    y = jnp.einsum("sbh,oh->bso", h_tm, w_out.astype(stream_dtype),
                   precision=prec, preferred_element_type=jnp.float32)
    return y[:B, :S] + b_out.astype(jnp.float32)


def _reference_forward(x, w_ih, w_hh, b_ih, b_hh, w_out, b_out):
    """Pure-JAX reference matching torch.nn.LSTM(batch_first=True) + Linear."""
    B, S, _ = x.shape
    H = w_hh.shape[1]
    hp = lax.Precision.HIGHEST

    def step(carry, x_t):
        h, c = carry
        gates = (jnp.einsum("bd,gd->bg", x_t, w_ih, precision=hp) + b_ih
                 + jnp.einsum("bh,gh->bg", h, w_hh, precision=hp) + b_hh)
        i_g = jax.nn.sigmoid(gates[:, 0 * H:1 * H])
        f_g = jax.nn.sigmoid(gates[:, 1 * H:2 * H])
        g_g = jnp.tanh(gates[:, 2 * H:3 * H])
        o_g = jax.nn.sigmoid(gates[:, 3 * H:4 * H])
        c_new = f_g * c + i_g * g_g
        h_new = o_g * jnp.tanh(c_new)
        return (h_new, c_new), h_new

    h0 = jnp.zeros((B, H), jnp.float32)
    c0 = jnp.zeros((B, H), jnp.float32)
    _, hs = jax.lax.scan(step, (h0, c0), jnp.transpose(x, (1, 0, 2)))
    lstm_out = jnp.transpose(hs, (1, 0, 2))                  # (B, S, H)
    return jnp.einsum("bsh,oh->bso", lstm_out, w_out, precision=hp) + b_out


if __name__ == "__main__":
    B, S = 2, 8
    input_dim, hidden_dim, output_dim = 16, 32, 8

    key = jax.random.PRNGKey(0)
    keys = jax.random.split(key, 7)
    k = 1.0 / jnp.sqrt(hidden_dim)

    # Deterministic params, PyTorch-shaped: U(-1/sqrt(H), 1/sqrt(H)).
    w_ih = jax.random.uniform(keys[0], (4 * hidden_dim, input_dim), jnp.float32, -k, k)
    w_hh = jax.random.uniform(keys[1], (4 * hidden_dim, hidden_dim), jnp.float32, -k, k)
    b_ih = jax.random.uniform(keys[2], (4 * hidden_dim,), jnp.float32, -k, k)
    b_hh = jax.random.uniform(keys[3], (4 * hidden_dim,), jnp.float32, -k, k)
    w_out = jax.random.uniform(keys[4], (output_dim, hidden_dim), jnp.float32, -k, k)
    b_out = jax.random.uniform(keys[5], (output_dim,), jnp.float32, -k, k)

    x = jax.random.normal(keys[6], (B, S, input_dim), jnp.float32)

    ref = _reference_forward(x, w_ih, w_hh, b_ih, b_hh, w_out, b_out)

    # f32-streamed path: tight check against the HIGHEST-precision reference.
    out = decoder_forward(x, w_ih, w_hh, b_ih, b_hh, w_out, b_out)
    out = jax.block_until_ready(out)
    assert out.shape == (B, S, output_dim)
    assert jnp.allclose(out, ref, atol=1e-5, rtol=1e-5), "f32 mismatch vs JAX reference"

    # bf16-streamed fast path (halves HBM bytes of the dominant pre-gate stream);
    # gate math stays f32 in-kernel, so only a loose tolerance is needed.
    out_bf16 = decoder_forward(x, w_ih, w_hh, b_ih, b_hh, w_out, b_out,
                               stream_dtype=jnp.bfloat16)
    out_bf16 = jax.block_until_ready(out_bf16)
    assert jnp.allclose(out_bf16, ref, atol=5e-2, rtol=5e-2), "bf16 mismatch vs JAX reference"

    print("KERNEL_OK")
</pallas_src>

<mosaic_0001>
module attributes {stable_mosaic.version = 11 : i64} {
  func.func @_lstm_chunk_kernel(%arg0: i32, %arg1: i32, %arg2: memref<8x16x128xf32, #tpu.memory_space<vmem>>, %arg3: memref<32x128xf32, #tpu.memory_space<vmem>>, %arg4: memref<8x16x32xf32, #tpu.memory_space<vmem>>, %arg5: memref<16x32xf32, #tpu.memory_space<vmem>>, %arg6: memref<16x32xf32, #tpu.memory_space<vmem>>) attributes {dimension_semantics = [#tpu.dimension_semantics<parallel>, #tpu.dimension_semantics<arbitrary>], iteration_bounds = array<i64: 1, 1>, scalar_prefetch = 0 : i64, scratch_operands = 2 : i64, tpu.core_type = #tpu.core_type<tc>, window_params = [{transform_indices = @transform_0, window_bounds = array<i64: 8, 16, 128>}, {pipeline_mode = #tpu.pipeline_mode<synchronous>, transform_indices = @transform_1, window_bounds = array<i64: 32, 128>}, {transform_indices = @transform_2, window_bounds = array<i64: 8, 16, 32>}]} {
    %c0_i32 = arith.constant 0 : i32
    %0 = arith.cmpi eq, %arg1, %c0_i32 : i32
    %1 = arith.extui %0 : i1 to i32
    %c0_i32_0 = arith.constant 0 : i32
    %2 = arith.cmpi ne, %1, %c0_i32_0 : i32
    scf.if %2 {
      %cst_106 = arith.constant 0.000000e+00 : f32
      %420 = vector.broadcast %cst_106 : f32 to vector<16x32xf32>
      %c0_107 = arith.constant 0 : index
      %c0_108 = arith.constant 0 : index
      %421 = vector.load %arg5[%c0_107, %c0_108] : memref<16x32xf32, #tpu.memory_space<vmem>>, vector<16x32xf32>
      tpu.vector_store %arg5[%c0_107, %c0_108], %420 {strides = array<i32>} : memref<16x32xf32, #tpu.memory_space<vmem>>, vector<16x32xf32>,
      %cst_109 = arith.constant 0.000000e+00 : f32
      %422 = vector.broadcast %cst_109 : f32 to vector<16x32xf32>
      %c0_110 = arith.constant 0 : index
      %c0_111 = arith.constant 0 : index
      %423 = vector.load %arg6[%c0_110, %c0_111] : memref<16x32xf32, #tpu.memory_space<vmem>>, vector<16x32xf32>
      tpu.vector_store %arg6[%c0_110, %c0_111], %422 {strides = array<i32>} : memref<16x32xf32, #tpu.memory_space<vmem>>, vector<16x32xf32>,
    } else {
    }
    %c0 = arith.constant 0 : index
    %c0_1 = arith.constant 0 : index
    %3 = vector.load %arg3[%c0, %c0_1] : memref<32x128xf32, #tpu.memory_space<vmem>>, vector<32x128xf32>
    %4 = tpu.iota {dimensions = array<i32: 1>} : vector<8x128xi32>
    %c64_i32 = arith.constant 64 : i32
    %5 = vector.broadcast %c64_i32 : i32 to vector<8x128xi32>
    %6 = arith.cmpi sge, %4, %5 : vector<8x128xi32>
    %c96_i32 = arith.constant 96 : i32
    %7 = vector.broadcast %c96_i32 : i32 to vector<8x128xi32>
    %8 = arith.cmpi slt, %4, %7 : vector<8x128xi32>
    %9 = arith.andi %6, %8 : vector<8x128xi1>
    %c0_2 = arith.constant 0 : index
    %c0_3 = arith.constant 0 : index
    %10 = vector.load %arg5[%c0_2, %c0_3] : memref<16x32xf32, #tpu.memory_space<vmem>>, vector<16x32xf32>
    %c0_4 = arith.constant 0 : index
    %c0_5 = arith.constant 0 : index
    %11 = vector.load %arg6[%c0_4, %c0_5] : memref<16x32xf32, #tpu.memory_space<vmem>>, vector<16x32xf32>
    %12 = vector.extract_strided_slice %10 {offsets = [0, 0], sizes = [8, 32], strides = [1, 1]} : vector<16x32xf32> to vector<8x32xf32>
    %13 = vector.extract_strided_slice %10 {offsets = [8, 0], sizes = [8, 32], strides = [1, 1]} : vector<16x32xf32> to vector<8x32xf32>
    %14 = vector.extract_strided_slice %11 {offsets = [0, 0], sizes = [8, 32], strides = [1, 1]} : vector<16x32xf32> to vector<8x32xf32>
    %15 = vector.extract_strided_slice %11 {offsets = [8, 0], sizes = [8, 32], strides = [1, 1]} : vector<16x32xf32> to vector<8x32xf32>
    %c0_i32_6 = arith.constant 0 : i32
    %16 = arith.index_cast %c0_i32_6 : i32 to index
    %c0_7 = arith.constant 0 : index
    %c0_8 = arith.constant 0 : index
    %17 = vector.load %arg2[%16, %c0_7, %c0_8] : memref<8x16x128xf32, #tpu.memory_space<vmem>>, vector<1x16x128xf32>
    %18 = vector.shape_cast %17 : vector<1x16x128xf32> to vector<16x128xf32>
    %19 = vector.extract_strided_slice %18 {offsets = [0, 0], sizes = [8, 128], strides = [1, 1]} : vector<16x128xf32> to vector<8x128xf32>
    %cst = arith.constant dense<0.000000e+00> : vector<8x128xf32>
    %20 = tpu.matmul %12, %3, %cst {dimension_numbers = #tpu.dot_dimension_numbers<[1], [0], [0], [1], [0, 0, 1, 1], [], []>} : vector<8x32xf32>, vector<32x128xf32>, vector<8x128xf32> -> vector<8x128xf32>
    %21 = arith.addf %19, %20 : vector<8x128xf32>
    %cst_9 = arith.constant 5.000000e-01 : f32
    %22 = vector.broadcast %cst_9 : f32 to vector<8x128xf32>
    %23 = arith.mulf %21, %22 : vector<8x128xf32>
    %24 = arith.select %9, %21, %23 : vector<8x128xi1>, vector<8x128xf32>
    %25 = math.tanh %24 : vector<8x128xf32>
    %cst_10 = arith.constant 1.000000e+00 : f32
    %26 = vector.broadcast %cst_10 : f32 to vector<8x128xf32>
    %27 = arith.addf %25, %26 : vector<8x128xf32>
    %cst_11 = arith.constant 5.000000e-01 : f32
    %28 = vector.broadcast %cst_11 : f32 to vector<8x128xf32>
    %29 = arith.mulf %27, %28 : vector<8x128xf32>
    %30 = arith.select %9, %25, %29 : vector<8x128xi1>, vector<8x128xf32>
    %31 = vector.extract_strided_slice %30 {offsets = [0, 0], sizes = [8, 32], strides = [1, 1]} : vector<8x128xf32> to vector<8x32xf32>
    %32 = vector.extract_strided_slice %30 {offsets = [0, 32], sizes = [8, 32], strides = [1, 1]} : vector<8x128xf32> to vector<8x32xf32>
    %33 = vector.extract_strided_slice %30 {offsets = [0, 64], sizes = [8, 32], strides = [1, 1]} : vector<8x128xf32> to vector<8x32xf32>
    %34 = vector.extract_strided_slice %30 {offsets = [0, 96], sizes = [8, 32], strides = [1, 1]} : vector<8x128xf32> to vector<8x32xf32>
    %35 = arith.mulf %32, %14 : vector<8x32xf32>
    %36 = arith.mulf %31, %33 : vector<8x32xf32>
    %37 = arith.addf %35, %36 : vector<8x32xf32>
    %38 = math.tanh %37 : vector<8x32xf32>
    %39 = arith.mulf %34, %38 : vector<8x32xf32>
    %40 = vector.extract_strided_slice %18 {offsets = [8, 0], sizes = [8, 128], strides = [1, 1]} : vector<16x128xf32> to vector<8x128xf32>
    %cst_12 = arith.constant dense<0.000000e+00> : vector<8x128xf32>
    %41 = tpu.matmul %13, %3, %cst_12 {dimension_numbers = #tpu.dot_dimension_numbers<[1], [0], [0], [1], [0, 0, 1, 1], [], []>} : vector<8x32xf32>, vector<32x128xf32>, vector<8x128xf32> -> vector<8x128xf32>
    %42 = arith.addf %40, %41 : vector<8x128xf32>
    %cst_13 = arith.constant 5.000000e-01 : f32
    %43 = vector.broadcast %cst_13 : f32 to vector<8x128xf32>
    %44 = arith.mulf %42, %43 : vector<8x128xf32>
    %45 = arith.select %9, %42, %44 : vector<8x128xi1>, vector<8x128xf32>
    %46 = math.tanh %45 : vector<8x128xf32>
    %cst_14 = arith.constant 1.000000e+00 : f32
    %47 = vector.broadcast %cst_14 : f32 to vector<8x128xf32>
    %48 = arith.addf %46, %47 : vector<8x128xf32>
    %cst_15 = arith.constant 5.000000e-01 : f32
    %49 = vector.broadcast %cst_15 : f32 to vector<8x128xf32>
    %50 = arith.mulf %48, %49 : vector<8x128xf32>
    %51 = arith.select %9, %46, %50 : vector<8x128xi1>, vector<8x128xf32>
    %52 = vector.extract_strided_slice %51 {offsets = [0, 0], sizes = [8, 32], strides = [1, 1]} : vector<8x128xf32> to vector<8x32xf32>
    %53 = vector.extract_strided_slice %51 {offsets = [0, 32], sizes = [8, 32], strides = [1, 1]} : vector<8x128xf32> to vector<8x32xf32>
    %54 = vector.extract_strided_slice %51 {offsets = [0, 64], sizes = [8, 32], strides = [1, 1]} : vector<8x128xf32> to vector<8x32xf32>
    %55 = vector.extract_strided_slice %51 {offsets = [0, 96], sizes = [8, 32], strides = [1, 1]} : vector<8x128xf32> to vector<8x32xf32>
    %56 = arith.mulf %53, %15 : vector<8x32xf32>
    %57 = arith.mulf %52, %54 : vector<8x32xf32>
    %58 = arith.addf %56, %57 : vector<8x32xf32>
    %59 = math.tanh %58 : vector<8x32xf32>
    %60 = arith.mulf %55, %59 : vector<8x32xf32>
    %61 = tpu.concatenate %39, %60 in 0 : vector<8x32xf32>, vector<8x32xf32> -> vector<16x32xf32>
    %62 = arith.index_cast %c0_i32_6 : i32 to index
    %c0_16 = arith.constant 0 : index
    %c0_17 = arith.constant 0 : index
    %63 = vector.load %arg4[%62, %c0_16, %c0_17] : memref<8x16x32xf32, #tpu.memory_space<vmem>>, vector<1x16x32xf32>
    %64 = vector.shape_cast %63 : vector<1x16x32xf32> to vector<16x32xf32>
    %65 = vector.shape_cast %61 : vector<16x32xf32> to vector<1x16x32xf32>
    tpu.vector_store %arg4[%62, %c0_16, %c0_17], %65 {strides = array<i32>} : memref<8x16x32xf32, #tpu.memory_space<vmem>>, vector<1x16x32xf32>,
    %c1_i32 = arith.constant 1 : i32
    %66 = arith.index_cast %c1_i32 : i32 to index
    %c0_18 = arith.constant 0 : index
    %c0_19 = arith.constant 0 : index
    %67 = vector.load %arg2[%66, %c0_18, %c0_19] : memref<8x16x128xf32, #tpu.memory_space<vmem>>, vector<1x16x128xf32>
    %68 = vector.shape_cast %67 : vector<1x16x128xf32> to vector<16x128xf32>
    %69 = vector.extract_strided_slice %68 {offsets = [0, 0], sizes = [8, 128], strides = [1, 1]} : vector<16x128xf32> to vector<8x128xf32>
    %cst_20 = arith.constant dense<0.000000e+00> : vector<8x128xf32>
    %70 = tpu.matmul %39, %3, %cst_20 {dimension_numbers = #tpu.dot_dimension_numbers<[1], [0], [0], [1], [0, 0, 1, 1], [], []>} : vector<8x32xf32>, vector<32x128xf32>, vector<8x128xf32> -> vector<8x128xf32>
    %71 = arith.addf %69, %70 : vector<8x128xf32>
    %cst_21 = arith.constant 5.000000e-01 : f32
    %72 = vector.broadcast %cst_21 : f32 to vector<8x128xf32>
    %73 = arith.mulf %71, %72 : vector<8x128xf32>
    %74 = arith.select %9, %71, %73 : vector<8x128xi1>, vector<8x128xf32>
    %75 = math.tanh %74 : vector<8x128xf32>
    %cst_22 = arith.constant 1.000000e+00 : f32
    %76 = vector.broadcast %cst_22 : f32 to vector<8x128xf32>
    %77 = arith.addf %75, %76 : vector<8x128xf32>
    %cst_23 = arith.constant 5.000000e-01 : f32
    %78 = vector.broadcast %cst_23 : f32 to vector<8x128xf32>
    %79 = arith.mulf %77, %78 : vector<8x128xf32>
    %80 = arith.select %9, %75, %79 : vector<8x128xi1>, vector<8x128xf32>
    %81 = vector.extract_strided_slice %80 {offsets = [0, 0], sizes = [8, 32], strides = [1, 1]} : vector<8x128xf32> to vector<8x32xf32>
    %82 = vector.extract_strided_slice %80 {offsets = [0, 32], sizes = [8, 32], strides = [1, 1]} : vector<8x128xf32> to vector<8x32xf32>
    %83 = vector.extract_strided_slice %80 {offsets = [0, 64], sizes = [8, 32], strides = [1, 1]} : vector<8x128xf32> to vector<8x32xf32>
    %84 = vector.extract_strided_slice %80 {offsets = [0, 96], sizes = [8, 32], strides = [1, 1]} : vector<8x128xf32> to vector<8x32xf32>
    %85 = arith.mulf %82, %37 : vector<8x32xf32>
    %86 = arith.mulf %81, %83 : vector<8x32xf32>
    %87 = arith.addf %85, %86 : vector<8x32xf32>
    %88 = math.tanh %87 : vector<8x32xf32>
    %89 = arith.mulf %84, %88 : vector<8x32xf32>
    %90 = vector.extract_strided_slice %68 {offsets = [8, 0], sizes = [8, 128], strides = [1, 1]} : vector<16x128xf32> to vector<8x128xf32>
    %cst_24 = arith.constant dense<0.000000e+00> : vector<8x128xf32>
    %91 = tpu.matmul %60, %3, %cst_24 {dimension_numbers = #tpu.dot_dimension_numbers<[1], [0], [0], [1], [0, 0, 1, 1], [], []>} : vector<8x32xf32>, vector<32x128xf32>, vector<8x128xf32> -> vector<8x128xf32>
    %92 = arith.addf %90, %91 : vector<8x128xf32>
    %cst_25 = arith.constant 5.000000e-01 : f32
    %93 = vector.broadcast %cst_25 : f32 to vector<8x128xf32>
    %94 = arith.mulf %92, %93 : vector<8x128xf32>
    %95 = arith.select %9, %92, %94 : vector<8x128xi1>, vector<8x128xf32>
    %96 = math.tanh %95 : vector<8x128xf32>
    %cst_26 = arith.constant 1.000000e+00 : f32
    %97 = vector.broadcast %cst_26 : f32 to vector<8x128xf32>
    %98 = arith.addf %96, %97 : vector<8x128xf32>
    %cst_27 = arith.constant 5.000000e-01 : f32
    %99 = vector.broadcast %cst_27 : f32 to vector<8x128xf32>
    %100 = arith.mulf %98, %99 : vector<8x128xf32>
    %101 = arith.select %9, %96, %100 : vector<8x128xi1>, vector<8x128xf32>
    %102 = vector.extract_strided_slice %101 {offsets = [0, 0], sizes = [8, 32], strides = [1, 1]} : vector<8x128xf32> to vector<8x32xf32>
    %103 = vector.extract_strided_slice %101 {offsets = [0, 32], sizes = [8, 32], strides = [1, 1]} : vector<8x128xf32> to vector<8x32xf32>
    %104 = vector.extract_strided_slice %101 {offsets = [0, 64], sizes = [8, 32], strides = [1, 1]} : vector<8x128xf32> to vector<8x32xf32>
    %105 = vector.extract_strided_slice %101 {offsets = [0, 96], sizes = [8, 32], strides = [1, 1]} : vector<8x128xf32> to vector<8x32xf32>
    %106 = arith.mulf %103, %58 : vector<8x32xf32>
    %107 = arith.mulf %102, %104 : vector<8x32xf32>
    %108 = arith.addf %106, %107 : vector<8x32xf32>
    %109 = math.tanh %108 : vector<8x32xf32>
    %110 = arith.mulf %105, %109 : vector<8x32xf32>
    %111 = tpu.concatenate %89, %110 in 0 : vector<8x32xf32>, vector<8x32xf32> -> vector<16x32xf32>
    %112 = arith.index_cast %c1_i32 : i32 to index
    %c0_28 = arith.constant 0 : index
    %c0_29 = arith.constant 0 : index
    %113 = vector.load %arg4[%112, %c0_28, %c0_29] : memref<8x16x32xf32, #tpu.memory_space<vmem>>, vector<1x16x32xf32>
    %114 = vector.shape_cast %113 : vector<1x16x32xf32> to vector<16x32xf32>
    %115 = vector.shape_cast %111 : vector<16x32xf32> to vector<1x16x32xf32>
    tpu.vector_store %arg4[%112, %c0_28, %c0_29], %115 {strides = array<i32>} : memref<8x16x32xf32, #tpu.memory_space<vmem>>, vector<1x16x32xf32>,
    %c2_i32 = arith.constant 2 : i32
    %116 = arith.index_cast %c2_i32 : i32 to index
    %c0_30 = arith.constant 0 : index
    %c0_31 = arith.constant 0 : index
    %117 = vector.load %arg2[%116, %c0_30, %c0_31] : memref<8x16x128xf32, #tpu.memory_space<vmem>>, vector<1x16x128xf32>
    %118 = vector.shape_cast %117 : vector<1x16x128xf32> to vector<16x128xf32>
    %119 = vector.extract_strided_slice %118 {offsets = [0, 0], sizes = [8, 128], strides = [1, 1]} : vector<16x128xf32> to vector<8x128xf32>
    %cst_32 = arith.constant dense<0.000000e+00> : vector<8x128xf32>
    %120 = tpu.matmul %89, %3, %cst_32 {dimension_numbers = #tpu.dot_dimension_numbers<[1], [0], [0], [1], [0, 0, 1, 1], [], []>} : vector<8x32xf32>, vector<32x128xf32>, vector<8x128xf32> -> vector<8x128xf32>
    %121 = arith.addf %119, %120 : vector<8x128xf32>
    %cst_33 = arith.constant 5.000000e-01 : f32
    %122 = vector.broadcast %cst_33 : f32 to vector<8x128xf32>
    %123 = arith.mulf %121, %122 : vector<8x128xf32>
    %124 = arith.select %9, %121, %123 : vector<8x128xi1>, vector<8x128xf32>
    %125 = math.tanh %124 : vector<8x128xf32>
    %cst_34 = arith.constant 1.000000e+00 : f32
    %126 = vector.broadcast %cst_34 : f32 to vector<8x128xf32>
    %127 = arith.addf %125, %126 : vector<8x128xf32>
    %cst_35 = arith.constant 5.000000e-01 : f32
    %128 = vector.broadcast %cst_35 : f32 to vector<8x128xf32>
    %129 = arith.mulf %127, %128 : vector<8x128xf32>
    %130 = arith.select %9, %125, %129 : vector<8x128xi1>, vector<8x128xf32>
    %131 = vector.extract_strided_slice %130 {offsets = [0, 0], sizes = [8, 32], strides = [1, 1]} : vector<8x128xf32> to vector<8x32xf32>
    %132 = vector.extract_strided_slice %130 {offsets = [0, 32], sizes = [8, 32], strides = [1, 1]} : vector<8x128xf32> to vector<8x32xf32>
    %133 = vector.extract_strided_slice %130 {offsets = [0, 64], sizes = [8, 32], strides = [1, 1]} : vector<8x128xf32> to vector<8x32xf32>
    %134 = vector.extract_strided_slice %130 {offsets = [0, 96], sizes = [8, 32], strides = [1, 1]} : vector<8x128xf32> to vector<8x32xf32>
    %135 = arith.mulf %132, %87 : vector<8x32xf32>
    %136 = arith.mulf %131, %133 : vector<8x32xf32>
    %137 = arith.addf %135, %136 : vector<8x32xf32>
    %138 = math.tanh %137 : vector<8x32xf32>
    %139 = arith.mulf %134, %138 : vector<8x32xf32>
    %140 = vector.extract_strided_slice %118 {offsets = [8, 0], sizes = [8, 128], strides = [1, 1]} : vector<16x128xf32> to vector<8x128xf32>
    %cst_36 = arith.constant dense<0.000000e+00> : vector<8x128xf32>
    %141 = tpu.matmul %110, %3, %cst_36 {dimension_numbers = #tpu.dot_dimension_numbers<[1], [0], [0], [1], [0, 0, 1, 1], [], []>} : vector<8x32xf32>, vector<32x128xf32>, vector<8x128xf32> -> vector<8x128xf32>
    %142 = arith.addf %140, %141 : vector<8x128xf32>
    %cst_37 = arith.constant 5.000000e-01 : f32
    %143 = vector.broadcast %cst_37 : f32 to vector<8x128xf32>
    %144 = arith.mulf %142, %143 : vector<8x128xf32>
    %145 = arith.select %9, %142, %144 : vector<8x128xi1>, vector<8x128xf32>
    %146 = math.tanh %145 : vector<8x128xf32>
    %cst_38 = arith.constant 1.000000e+00 : f32
    %147 = vector.broadcast %cst_38 : f32 to vector<8x128xf32>
    %148 = arith.addf %146, %147 : vector<8x128xf32>
    %cst_39 = arith.constant 5.000000e-01 : f32
    %149 = vector.broadcast %cst_39 : f32 to vector<8x128xf32>
    %150 = arith.mulf %148, %149 : vector<8x128xf32>
    %151 = arith.select %9, %146, %150 : vector<8x128xi1>, vector<8x128xf32>
    %152 = vector.extract_strided_slice %151 {offsets = [0, 0], sizes = [8, 32], strides = [1, 1]} : vector<8x128xf32> to vector<8x32xf32>
    %153 = vector.extract_strided_slice %151 {offsets = [0, 32], sizes = [8, 32], strides = [1, 1]} : vector<8x128xf32> to vector<8x32xf32>
    %154 = vector.extract_strided_slice %151 {offsets = [0, 64], sizes = [8, 32], strides = [1, 1]} : vector<8x128xf32> to vector<8x32xf32>
    %155 = vector.extract_strided_slice %151 {offsets = [0, 96], sizes = [8, 32], strides = [1, 1]} : vector<8x128xf32> to vector<8x32xf32>
    %156 = arith.mulf %153, %108 : vector<8x32xf32>
    %157 = arith.mulf %152, %154 : vector<8x32xf32>
    %158 = arith.addf %156, %157 : vector<8x32xf32>
    %159 = math.tanh %158 : vector<8x32xf32>
    %160 = arith.mulf %155, %159 : vector<8x32xf32>
    %161 = tpu.concatenate %139, %160 in 0 : vector<8x32xf32>, vector<8x32xf32> -> vector<16x32xf32>
    %162 = arith.index_cast %c2_i32 : i32 to index
    %c0_40 = arith.constant 0 : index
    %c0_41 = arith.constant 0 : index
    %163 = vector.load %arg4[%162, %c0_40, %c0_41] : memref<8x16x32xf32, #tpu.memory_space<vmem>>, vector<1x16x32xf32>
    %164 = vector.shape_cast %163 : vector<1x16x32xf32> to vector<16x32xf32>
    %165 = vector.shape_cast %161 : vector<16x32xf32> to vector<1x16x32xf32>
    tpu.vector_store %arg4[%162, %c0_40, %c0_41], %165 {strides = array<i32>} : memref<8x16x32xf32, #tpu.memory_space<vmem>>, vector<1x16x32xf32>,
    %c3_i32 = arith.constant 3 : i32
    %166 = arith.index_cast %c3_i32 : i32 to index
    %c0_42 = arith.constant 0 : index
    %c0_43 = arith.constant 0 : index
    %167 = vector.load %arg2[%166, %c0_42, %c0_43] : memref<8x16x128xf32, #tpu.memory_space<vmem>>, vector<1x16x128xf32>
    %168 = vector.shape_cast %167 : vector<1x16x128xf32> to vector<16x128xf32>
    %169 = vector.extract_strided_slice %168 {offsets = [0, 0], sizes = [8, 128], strides = [1, 1]} : vector<16x128xf32> to vector<8x128xf32>
    %cst_44 = arith.constant dense<0.000000e+00> : vector<8x128xf32>
    %170 = tpu.matmul %139, %3, %cst_44 {dimension_numbers = #tpu.dot_dimension_numbers<[1], [0], [0], [1], [0, 0, 1, 1], [], []>} : vector<8x32xf32>, vector<32x128xf32>, vector<8x128xf32> -> vector<8x128xf32>
    %171 = arith.addf %169, %170 : vector<8x128xf32>
    %cst_45 = arith.constant 5.000000e-01 : f32
    %172 = vector.broadcast %cst_45 : f32 to vector<8x128xf32>
    %173 = arith.mulf %171, %172 : vector<8x128xf32>
    %174 = arith.select %9, %171, %173 : vector<8x128xi1>, vector<8x128xf32>
    %175 = math.tanh %174 : vector<8x128xf32>
    %cst_46 = arith.constant 1.000000e+00 : f32
    %176 = vector.broadcast %cst_46 : f32 to vector<8x128xf32>
    %177 = arith.addf %175, %176 : vector<8x128xf32>
    %cst_47 = arith.constant 5.000000e-01 : f32
    %178 = vector.broadcast %cst_47 : f32 to vector<8x128xf32>
    %179 = arith.mulf %177, %178 : vector<8x128xf32>
    %180 = arith.select %9, %175, %179 : vector<8x128xi1>, vector<8x128xf32>
    %181 = vector.extract_strided_slice %180 {offsets = [0, 0], sizes = [8, 32], strides = [1, 1]} : vector<8x128xf32> to vector<8x32xf32>
    %182 = vector.extract_strided_slice %180 {offsets = [0, 32], sizes = [8, 32], strides = [1, 1]} : vector<8x128xf32> to vector<8x32xf32>
    %183 = vector.extract_strided_slice %180 {offsets = [0, 64], sizes = [8, 32], strides = [1, 1]} : vector<8x128xf32> to vector<8x32xf32>
    %184 = vector.extract_strided_slice %180 {offsets = [0, 96], sizes = [8, 32], strides = [1, 1]} : vector<8x128xf32> to vector<8x32xf32>
    %185 = arith.mulf %182, %137 : vector<8x32xf32>
    %186 = arith.mulf %181, %183 : vector<8x32xf32>
    %187 = arith.addf %185, %186 : vector<8x32xf32>
    %188 = math.tanh %187 : vector<8x32xf32>
    %189 = arith.mulf %184, %188 : vector<8x32xf32>
    %190 = vector.extract_strided_slice %168 {offsets = [8, 0], sizes = [8, 128], strides = [1, 1]} : vector<16x128xf32> to vector<8x128xf32>
    %cst_48 = arith.constant dense<0.000000e+00> : vector<8x128xf32>
    %191 = tpu.matmul %160, %3, %cst_48 {dimension_numbers = #tpu.dot_dimension_numbers<[1], [0], [0], [1], [0, 0, 1, 1], [], []>} : vector<8x32xf32>, vector<32x128xf32>, vector<8x128xf32> -> vector<8x128xf32>
    %192 = arith.addf %190, %191 : vector<8x128xf32>
    %cst_49 = arith.constant 5.000000e-01 : f32
    %193 = vector.broadcast %cst_49 : f32 to vector<8x128xf32>
    %194 = arith.mulf %192, %193 : vector<8x128xf32>
    %195 = arith.select %9, %192, %194 : vector<8x128xi1>, vector<8x128xf32>
    %196 = math.tanh %195 : vector<8x128xf32>
    %cst_50 = arith.constant 1.000000e+00 : f32
    %197 = vector.broadcast %cst_50 : f32 to vector<8x128xf32>
    %198 = arith.addf %196, %197 : vector<8x128xf32>
    %cst_51 = arith.constant 5.000000e-01 : f32
    %199 = vector.broadcast %cst_51 : f32 to vector<8x128xf32>
    %200 = arith.mulf %198, %199 : vector<8x128xf32>
    %201 = arith.select %9, %196, %200 : vector<8x128xi1>, vector<8x128xf32>
    %202 = vector.extract_strided_slice %201 {offsets = [0, 0], sizes = [8, 32], strides = [1, 1]} : vector<8x128xf32> to vector<8x32xf32>
    %203 = vector.extract_strided_slice %201 {offsets = [0, 32], sizes = [8, 32], strides = [1, 1]} : vector<8x128xf32> to vector<8x32xf32>
    %204 = vector.extract_strided_slice %201 {offsets = [0, 64], sizes = [8, 32], strides = [1, 1]} : vector<8x128xf32> to vector<8x32xf32>
    %205 = vector.extract_strided_slice %201 {offsets = [0, 96], sizes = [8, 32], strides = [1, 1]} : vector<8x128xf32> to vector<8x32xf32>
    %206 = arith.mulf %203, %158 : vector<8x32xf32>
    %207 = arith.mulf %202, %204 : vector<8x32xf32>
    %208 = arith.addf %206, %207 : vector<8x32xf32>
    %209 = math.tanh %208 : vector<8x32xf32>
    %210 = arith.mulf %205, %209 : vector<8x32xf32>
    %211 = tpu.concatenate %189, %210 in 0 : vector<8x32xf32>, vector<8x32xf32> -> vector<16x32xf32>
    %212 = arith.index_cast %c3_i32 : i32 to index
    %c0_52 = arith.constant 0 : index
    %c0_53 = arith.constant 0 : index
    %213 = vector.load %arg4[%212, %c0_52, %c0_53] : memref<8x16x32xf32, #tpu.memory_space<vmem>>, vector<1x16x32xf32>
    %214 = vector.shape_cast %213 : vector<1x16x32xf32> to vector<16x32xf32>
    %215 = vector.shape_cast %211 : vector<16x32xf32> to vector<1x16x32xf32>
    tpu.vector_store %arg4[%212, %c0_52, %c0_53], %215 {strides = array<i32>} : memref<8x16x32xf32, #tpu.memory_space<vmem>>, vector<1x16x32xf32>,
    %c4_i32 = arith.constant 4 : i32
    %216 = arith.index_cast %c4_i32 : i32 to index
    %c0_54 = arith.constant 0 : index
    %c0_55 = arith.constant 0 : index
    %217 = vector.load %arg2[%216, %c0_54, %c0_55] : memref<8x16x128xf32, #tpu.memory_space<vmem>>, vector<1x16x128xf32>
    %218 = vector.shape_cast %217 : vector<1x16x128xf32> to vector<16x128xf32>
    %219 = vector.extract_strided_slice %218 {offsets = [0, 0], sizes = [8, 128], strides = [1, 1]} : vector<16x128xf32> to vector<8x128xf32>
    %cst_56 = arith.constant dense<0.000000e+00> : vector<8x128xf32>
    %220 = tpu.matmul %189, %3, %cst_56 {dimension_numbers = #tpu.dot_dimension_numbers<[1], [0], [0], [1], [0, 0, 1, 1], [], []>} : vector<8x32xf32>, vector<32x128xf32>, vector<8x128xf32> -> vector<8x128xf32>
    %221 = arith.addf %219, %220 : vector<8x128xf32>
    %cst_57 = arith.constant 5.000000e-01 : f32
    %222 = vector.broadcast %cst_57 : f32 to vector<8x128xf32>
    %223 = arith.mulf %221, %222 : vector<8x128xf32>
    %224 = arith.select %9, %221, %223 : vector<8x128xi1>, vector<8x128xf32>
    %225 = math.tanh %224 : vector<8x128xf32>
    %cst_58 = arith.constant 1.000000e+00 : f32
    %226 = vector.broadcast %cst_58 : f32 to vector<8x128xf32>
    %227 = arith.addf %225, %226 : vector<8x128xf32>
    %cst_59 = arith.constant 5.000000e-01 : f32
    %228 = vector.broadcast %cst_59 : f32 to vector<8x128xf32>
    %229 = arith.mulf %227, %228 : vector<8x128xf32>
    %230 = arith.select %9, %225, %229 : vector<8x128xi1>, vector<8x128xf32>
    %231 = vector.extract_strided_slice %230 {offsets = [0, 0], sizes = [8, 32], strides = [1, 1]} : vector<8x128xf32> to vector<8x32xf32>
    %232 = vector.extract_strided_slice %230 {offsets = [0, 32], sizes = [8, 32], strides = [1, 1]} : vector<8x128xf32> to vector<8x32xf32>
    %233 = vector.extract_strided_slice %230 {offsets = [0, 64], sizes = [8, 32], strides = [1, 1]} : vector<8x128xf32> to vector<8x32xf32>
    %234 = vector.extract_strided_slice %230 {offsets = [0, 96], sizes = [8, 32], strides = [1, 1]} : vector<8x128xf32> to vector<8x32xf32>
    %235 = arith.mulf %232, %187 : vector<8x32xf32>
    %236 = arith.mulf %231, %233 : vector<8x32xf32>
    %237 = arith.addf %235, %236 : vector<8x32xf32>
    %238 = math.tanh %237 : vector<8x32xf32>
    %239 = arith.mulf %234, %238 : vector<8x32xf32>
    %240 = vector.extract_strided_slice %218 {offsets = [8, 0], sizes = [8, 128], strides = [1, 1]} : vector<16x128xf32> to vector<8x128xf32>
    %cst_60 = arith.constant dense<0.000000e+00> : vector<8x128xf32>
    %241 = tpu.matmul %210, %3, %cst_60 {dimension_numbers = #tpu.dot_dimension_numbers<[1], [0], [0], [1], [0, 0, 1, 1], [], []>} : vector<8x32xf32>, vector<32x128xf32>, vector<8x128xf32> -> vector<8x128xf32>
    %242 = arith.addf %240, %241 : vector<8x128xf32>
    %cst_61 = arith.constant 5.000000e-01 : f32
    %243 = vector.broadcast %cst_61 : f32 to vector<8x128xf32>
    %244 = arith.mulf %242, %243 : vector<8x128xf32>
    %245 = arith.select %9, %242, %244 : vector<8x128xi1>, vector<8x128xf32>
    %246 = math.tanh %245 : vector<8x128xf32>
    %cst_62 = arith.constant 1.000000e+00 : f32
    %247 = vector.broadcast %cst_62 : f32 to vector<8x128xf32>
    %248 = arith.addf %246, %247 : vector<8x128xf32>
    %cst_63 = arith.constant 5.000000e-01 : f32
    %249 = vector.broadcast %cst_63 : f32 to vector<8x128xf32>
    %250 = arith.mulf %248, %249 : vector<8x128xf32>
    %251 = arith.select %9, %246, %250 : vector<8x128xi1>, vector<8x128xf32>
    %252 = vector.extract_strided_slice %251 {offsets = [0, 0], sizes = [8, 32], strides = [1, 1]} : vector<8x128xf32> to vector<8x32xf32>
    %253 = vector.extract_strided_slice %251 {offsets = [0, 32], sizes = [8, 32], strides = [1, 1]} : vector<8x128xf32> to vector<8x32xf32>
    %254 = vector.extract_strided_slice %251 {offsets = [0, 64], sizes = [8, 32], strides = [1, 1]} : vector<8x128xf32> to vector<8x32xf32>
    %255 = vector.extract_strided_slice %251 {offsets = [0, 96], sizes = [8, 32], strides = [1, 1]} : vector<8x128xf32> to vector<8x32xf32>
    %256 = arith.mulf %253, %208 : vector<8x32xf32>
    %257 = arith.mulf %252, %254 : vector<8x32xf32>
    %258 = arith.addf %256, %257 : vector<8x32xf32>
    %259 = math.tanh %258 : vector<8x32xf32>
    %260 = arith.mulf %255, %259 : vector<8x32xf32>
    %261 = tpu.concatenate %239, %260 in 0 : vector<8x32xf32>, vector<8x32xf32> -> vector<16x32xf32>
    %262 = arith.index_cast %c4_i32 : i32 to index
    %c0_64 = arith.constant 0 : index
    %c0_65 = arith.constant 0 : index
    %263 = vector.load %arg4[%262, %c0_64, %c0_65] : memref<8x16x32xf32, #tpu.memory_space<vmem>>, vector<1x16x32xf32>
    %264 = vector.shape_cast %263 : vector<1x16x32xf32> to vector<16x32xf32>
    %265 = vector.shape_cast %261 : vector<16x32xf32> to vector<1x16x32xf32>
    tpu.vector_store %arg4[%262, %c0_64, %c0_65], %265 {strides = array<i32>} : memref<8x16x32xf32, #tpu.memory_space<vmem>>, vector<1x16x32xf32>,
    %c5_i32 = arith.constant 5 : i32
    %266 = arith.index_cast %c5_i32 : i32 to index
    %c0_66 = arith.constant 0 : index
    %c0_67 = arith.constant 0 : index
    %267 = vector.load %arg2[%266, %c0_66, %c0_67] : memref<8x16x128xf32, #tpu.memory_space<vmem>>, vector<1x16x128xf32>
    %268 = vector.shape_cast %267 : vector<1x16x128xf32> to vector<16x128xf32>
    %269 = vector.extract_strided_slice %268 {offsets = [0, 0], sizes = [8, 128], strides = [1, 1]} : vector<16x128xf32> to vector<8x128xf32>
    %cst_68 = arith.constant dense<0.000000e+00> : vector<8x128xf32>
    %270 = tpu.matmul %239, %3, %cst_68 {dimension_numbers = #tpu.dot_dimension_numbers<[1], [0], [0], [1], [0, 0, 1, 1], [], []>} : vector<8x32xf32>, vector<32x128xf32>, vector<8x128xf32> -> vector<8x128xf32>
    %271 = arith.addf %269, %270 : vector<8x128xf32>
    %cst_69 = arith.constant 5.000000e-01 : f32
    %272 = vector.broadcast %cst_69 : f32 to vector<8x128xf32>
    %273 = arith.mulf %271, %272 : vector<8x128xf32>
    %274 = arith.select %9, %271, %273 : vector<8x128xi1>, vector<8x128xf32>
    %275 = math.tanh %274 : vector<8x128xf32>
    %cst_70 = arith.constant 1.000000e+00 : f32
    %276 = vector.broadcast %cst_70 : f32 to vector<8x128xf32>
    %277 = arith.addf %275, %276 : vector<8x128xf32>
    %cst_71 = arith.constant 5.000000e-01 : f32
    %278 = vector.broadcast %cst_71 : f32 to vector<8x128xf32>
    %279 = arith.mulf %277, %278 : vector<8x128xf32>
    %280 = arith.select %9, %275, %279 : vector<8x128xi1>, vector<8x128xf32>
    %281 = vector.extract_strided_slice %280 {offsets = [0, 0], sizes = [8, 32], strides = [1, 1]} : vector<8x128xf32> to vector<8x32xf32>
    %282 = vector.extract_strided_slice %280 {offsets = [0, 32], sizes = [8, 32], strides = [1, 1]} : vector<8x128xf32> to vector<8x32xf32>
    %283 = vector.extract_strided_slice %280 {offsets = [0, 64], sizes = [8, 32], strides = [1, 1]} : vector<8x128xf32> to vector<8x32xf32>
    %284 = vector.extract_strided_slice %280 {offsets = [0, 96], sizes = [8, 32], strides = [1, 1]} : vector<8x128xf32> to vector<8x32xf32>
    %285 = arith.mulf %282, %237 : vector<8x32xf32>
    %286 = arith.mulf %281, %283 : vector<8x32xf32>
    %287 = arith.addf %285, %286 : vector<8x32xf32>
    %288 = math.tanh %287 : vector<8x32xf32>
    %289 = arith.mulf %284, %288 : vector<8x32xf32>
    %290 = vector.extract_strided_slice %268 {offsets = [8, 0], sizes = [8, 128], strides = [1, 1]} : vector<16x128xf32> to vector<8x128xf32>
    %cst_72 = arith.constant dense<0.000000e+00> : vector<8x128xf32>
    %291 = tpu.matmul %260, %3, %cst_72 {dimension_numbers = #tpu.dot_dimension_numbers<[1], [0], [0], [1], [0, 0, 1, 1], [], []>} : vector<8x32xf32>, vector<32x128xf32>, vector<8x128xf32> -> vector<8x128xf32>
    %292 = arith.addf %290, %291 : vector<8x128xf32>
    %cst_73 = arith.constant 5.000000e-01 : f32
    %293 = vector.broadcast %cst_73 : f32 to vector<8x128xf32>
    %294 = arith.mulf %292, %293 : vector<8x128xf32>
    %295 = arith.select %9, %292, %294 : vector<8x128xi1>, vector<8x128xf32>
    %296 = math.tanh %295 : vector<8x128xf32>
    %cst_74 = arith.constant 1.000000e+00 : f32
    %297 = vector.broadcast %cst_74 : f32 to vector<8x128xf32>
    %298 = arith.addf %296, %297 : vector<8x128xf32>
    %cst_75 = arith.constant 5.000000e-01 : f32
    %299 = vector.broadcast %cst_75 : f32 to vector<8x128xf32>
    %300 = arith.mulf %298, %299 : vector<8x128xf32>
    %301 = arith.select %9, %296, %300 : vector<8x128xi1>, vector<8x128xf32>
    %302 = vector.extract_strided_slice %301 {offsets = [0, 0], sizes = [8, 32], strides = [1, 1]} : vector<8x128xf32> to vector<8x32xf32>
    %303 = vector.extract_strided_slice %301 {offsets = [0, 32], sizes = [8, 32], strides = [1, 1]} : vector<8x128xf32> to vector<8x32xf32>
    %304 = vector.extract_strided_slice %301 {offsets = [0, 64], sizes = [8, 32], strides = [1, 1]} : vector<8x128xf32> to vector<8x32xf32>
    %305 = vector.extract_strided_slice %301 {offsets = [0, 96], sizes = [8, 32], strides = [1, 1]} : vector<8x128xf32> to vector<8x32xf32>
    %306 = arith.mulf %303, %258 : vector<8x32xf32>
    %307 = arith.mulf %302, %304 : vector<8x32xf32>
    %308 = arith.addf %306, %307 : vector<8x32xf32>
    %309 = math.tanh %308 : vector<8x32xf32>
    %310 = arith.mulf %305, %309 : vector<8x32xf32>
    %311 = tpu.concatenate %289, %310 in 0 : vector<8x32xf32>, vector<8x32xf32> -> vector<16x32xf32>
    %312 = arith.index_cast %c5_i32 : i32 to index
    %c0_76 = arith.constant 0 : index
    %c0_77 = arith.constant 0 : index
    %313 = vector.load %arg4[%312, %c0_76, %c0_77] : memref<8x16x32xf32, #tpu.memory_space<vmem>>, vector<1x16x32xf32>
    %314 = vector.shape_cast %313 : vector<1x16x32xf32> to vector<16x32xf32>
    %315 = vector.shape_cast %311 : vector<16x32xf32> to vector<1x16x32xf32>
    tpu.vector_store %arg4[%312, %c0_76, %c0_77], %315 {strides = array<i32>} : memref<8x16x32xf32, #tpu.memory_space<vmem>>, vector<1x16x32xf32>,
    %c6_i32 = arith.constant 6 : i32
    %316 = arith.index_cast %c6_i32 : i32 to index
    %c0_78 = arith.constant 0 : index
    %c0_79 = arith.constant 0 : index
    %317 = vector.load %arg2[%316, %c0_78, %c0_79] : memref<8x16x128xf32, #tpu.memory_space<vmem>>, vector<1x16x128xf32>
    %318 = vector.shape_cast %317 : vector<1x16x128xf32> to vector<16x128xf32>
    %319 = vector.extract_strided_slice %318 {offsets = [0, 0], sizes = [8, 128], strides = [1, 1]} : vector<16x128xf32> to vector<8x128xf32>
    %cst_80 = arith.constant dense<0.000000e+00> : vector<8x128xf32>
    %320 = tpu.matmul %289, %3, %cst_80 {dimension_numbers = #tpu.dot_dimension_numbers<[1], [0], [0], [1], [0, 0, 1, 1], [], []>} : vector<8x32xf32>, vector<32x128xf32>, vector<8x128xf32> -> vector<8x128xf32>
    %321 = arith.addf %319, %320 : vector<8x128xf32>
    %cst_81 = arith.constant 5.000000e-01 : f32
    %322 = vector.broadcast %cst_81 : f32 to vector<8x128xf32>
    %323 = arith.mulf %321, %322 : vector<8x128xf32>
    %324 = arith.select %9, %321, %323 : vector<8x128xi1>, vector<8x128xf32>
    %325 = math.tanh %324 : vector<8x128xf32>
    %cst_82 = arith.constant 1.000000e+00 : f32
    %326 = vector.broadcast %cst_82 : f32 to vector<8x128xf32>
    %327 = arith.addf %325, %326 : vector<8x128xf32>
    %cst_83 = arith.constant 5.000000e-01 : f32
    %328 = vector.broadcast %cst_83 : f32 to vector<8x128xf32>
    %329 = arith.mulf %327, %328 : vector<8x128xf32>
    %330 = arith.select %9, %325, %329 : vector<8x128xi1>, vector<8x128xf32>
    %331 = vector.extract_strided_slice %330 {offsets = [0, 0], sizes = [8, 32], strides = [1, 1]} : vector<8x128xf32> to vector<8x32xf32>
    %332 = vector.extract_strided_slice %330 {offsets = [0, 32], sizes = [8, 32], strides = [1, 1]} : vector<8x128xf32> to vector<8x32xf32>
    %333 = vector.extract_strided_slice %330 {offsets = [0, 64], sizes = [8, 32], strides = [1, 1]} : vector<8x128xf32> to vector<8x32xf32>
    %334 = vector.extract_strided_slice %330 {offsets = [0, 96], sizes = [8, 32], strides = [1, 1]} : vector<8x128xf32> to vector<8x32xf32>
    %335 = arith.mulf %332, %287 : vector<8x32xf32>
    %336 = arith.mulf %331, %333 : vector<8x32xf32>
    %337 = arith.addf %335, %336 : vector<8x32xf32>
    %338 = math.tanh %337 : vector<8x32xf32>
    %339 = arith.mulf %334, %338 : vector<8x32xf32>
    %340 = vector.extract_strided_slice %318 {offsets = [8, 0], sizes = [8, 128], strides = [1, 1]} : vector<16x128xf32> to vector<8x128xf32>
    %cst_84 = arith.constant dense<0.000000e+00> : vector<8x128xf32>
    %341 = tpu.matmul %310, %3, %cst_84 {dimension_numbers = #tpu.dot_dimension_numbers<[1], [0], [0], [1], [0, 0, 1, 1], [], []>} : vector<8x32xf32>, vector<32x128xf32>, vector<8x128xf32> -> vector<8x128xf32>
    %342 = arith.addf %340, %341 : vector<8x128xf32>
    %cst_85 = arith.constant 5.000000e-01 : f32
    %343 = vector.broadcast %cst_85 : f32 to vector<8x128xf32>
    %344 = arith.mulf %342, %343 : vector<8x128xf32>
    %345 = arith.select %9, %342, %344 : vector<8x128xi1>, vector<8x128xf32>
    %346 = math.tanh %345 : vector<8x128xf32>
    %cst_86 = arith.constant 1.000000e+00 : f32
    %347 = vector.broadcast %cst_86 : f32 to vector<8x128xf32>
    %348 = arith.addf %346, %347 : vector<8x128xf32>
    %cst_87 = arith.constant 5.000000e-01 : f32
    %349 = vector.broadcast %cst_87 : f32 to vector<8x128xf32>
    %350 = arith.mulf %348, %349 : vector<8x128xf32>
    %351 = arith.select %9, %346, %350 : vector<8x128xi1>, vector<8x128xf32>
    %352 = vector.extract_strided_slice %351 {offsets = [0, 0], sizes = [8, 32], strides = [1, 1]} : vector<8x128xf32> to vector<8x32xf32>
    %353 = vector.extract_strided_slice %351 {offsets = [0, 32], sizes = [8, 32], strides = [1, 1]} : vector<8x128xf32> to vector<8x32xf32>
    %354 = vector.extract_strided_slice %351 {offsets = [0, 64], sizes = [8, 32], strides = [1, 1]} : vector<8x128xf32> to vector<8x32xf32>
    %355 = vector.extract_strided_slice %351 {offsets = [0, 96], sizes = [8, 32], strides = [1, 1]} : vector<8x128xf32> to vector<8x32xf32>
    %356 = arith.mulf %353, %308 : vector<8x32xf32>
    %357 = arith.mulf %352, %354 : vector<8x32xf32>
    %358 = arith.addf %356, %357 : vector<8x32xf32>
    %359 = math.tanh %358 : vector<8x32xf32>
    %360 = arith.mulf %355, %359 : vector<8x32xf32>
    %361 = tpu.concatenate %339, %360 in 0 : vector<8x32xf32>, vector<8x32xf32> -> vector<16x32xf32>
    %362 = arith.index_cast %c6_i32 : i32 to index
    %c0_88 = arith.constant 0 : index
    %c0_89 = arith.constant 0 : index
    %363 = vector.load %arg4[%362, %c0_88, %c0_89] : memref<8x16x32xf32, #tpu.memory_space<vmem>>, vector<1x16x32xf32>
    %364 = vector.shape_cast %363 : vector<1x16x32xf32> to vector<16x32xf32>
    %365 = vector.shape_cast %361 : vector<16x32xf32> to vector<1x16x32xf32>
    tpu.vector_store %arg4[%362, %c0_88, %c0_89], %365 {strides = array<i32>} : memref<8x16x32xf32, #tpu.memory_space<vmem>>, vector<1x16x32xf32>,
    %c7_i32 = arith.constant 7 : i32
    %366 = arith.index_cast %c7_i32 : i32 to index
    %c0_90 = arith.constant 0 : index
    %c0_91 = arith.constant 0 : index
    %367 = vector.load %arg2[%366, %c0_90, %c0_91] : memref<8x16x128xf32, #tpu.memory_space<vmem>>, vector<1x16x128xf32>
    %368 = vector.shape_cast %367 : vector<1x16x128xf32> to vector<16x128xf32>
    %369 = vector.extract_strided_slice %368 {offsets = [0, 0], sizes = [8, 128], strides = [1, 1]} : vector<16x128xf32> to vector<8x128xf32>
    %cst_92 = arith.constant dense<0.000000e+00> : vector<8x128xf32>
    %370 = tpu.matmul %339, %3, %cst_92 {dimension_numbers = #tpu.dot_dimension_numbers<[1], [0], [0], [1], [0, 0, 1, 1], [], []>} : vector<8x32xf32>, vector<32x128xf32>, vector<8x128xf32> -> vector<8x128xf32>
    %371 = arith.addf %369, %370 : vector<8x128xf32>
    %cst_93 = arith.constant 5.000000e-01 : f32
    %372 = vector.broadcast %cst_93 : f32 to vector<8x128xf32>
    %373 = arith.mulf %371, %372 : vector<8x128xf32>
    %374 = arith.select %9, %371, %373 : vector<8x128xi1>, vector<8x128xf32>
    %375 = math.tanh %374 : vector<8x128xf32>
    %cst_94 = arith.constant 1.000000e+00 : f32
    %376 = vector.broadcast %cst_94 : f32 to vector<8x128xf32>
    %377 = arith.addf %375, %376 : vector<8x128xf32>
    %cst_95 = arith.constant 5.000000e-01 : f32
    %378 = vector.broadcast %cst_95 : f32 to vector<8x128xf32>
    %379 = arith.mulf %377, %378 : vector<8x128xf32>
    %380 = arith.select %9, %375, %379 : vector<8x128xi1>, vector<8x128xf32>
    %381 = vector.extract_strided_slice %380 {offsets = [0, 0], sizes = [8, 32], strides = [1, 1]} : vector<8x128xf32> to vector<8x32xf32>
    %382 = vector.extract_strided_slice %380 {offsets = [0, 32], sizes = [8, 32], strides = [1, 1]} : vector<8x128xf32> to vector<8x32xf32>
    %383 = vector.extract_strided_slice %380 {offsets = [0, 64], sizes = [8, 32], strides = [1, 1]} : vector<8x128xf32> to vector<8x32xf32>
    %384 = vector.extract_strided_slice %380 {offsets = [0, 96], sizes = [8, 32], strides = [1, 1]} : vector<8x128xf32> to vector<8x32xf32>
    %385 = arith.mulf %382, %337 : vector<8x32xf32>
    %386 = arith.mulf %381, %383 : vector<8x32xf32>
    %387 = arith.addf %385, %386 : vector<8x32xf32>
    %388 = math.tanh %387 : vector<8x32xf32>
    %389 = arith.mulf %384, %388 : vector<8x32xf32>
    %390 = vector.extract_strided_slice %368 {offsets = [8, 0], sizes = [8, 128], strides = [1, 1]} : vector<16x128xf32> to vector<8x128xf32>
    %cst_96 = arith.constant dense<0.000000e+00> : vector<8x128xf32>
    %391 = tpu.matmul %360, %3, %cst_96 {dimension_numbers = #tpu.dot_dimension_numbers<[1], [0], [0], [1], [0, 0, 1, 1], [], []>} : vector<8x32xf32>, vector<32x128xf32>, vector<8x128xf32> -> vector<8x128xf32>
    %392 = arith.addf %390, %391 : vector<8x128xf32>
    %cst_97 = arith.constant 5.000000e-01 : f32
    %393 = vector.broadcast %cst_97 : f32 to vector<8x128xf32>
    %394 = arith.mulf %392, %393 : vector<8x128xf32>
    %395 = arith.select %9, %392, %394 : vector<8x128xi1>, vector<8x128xf32>
    %396 = math.tanh %395 : vector<8x128xf32>
    %cst_98 = arith.constant 1.000000e+00 : f32
    %397 = vector.broadcast %cst_98 : f32 to vector<8x128xf32>
    %398 = arith.addf %396, %397 : vector<8x128xf32>
    %cst_99 = arith.constant 5.000000e-01 : f32
    %399 = vector.broadcast %cst_99 : f32 to vector<8x128xf32>
    %400 = arith.mulf %398, %399 : vector<8x128xf32>
    %401 = arith.select %9, %396, %400 : vector<8x128xi1>, vector<8x128xf32>
    %402 = vector.extract_strided_slice %401 {offsets = [0, 0], sizes = [8, 32], strides = [1, 1]} : vector<8x128xf32> to vector<8x32xf32>
    %403 = vector.extract_strided_slice %401 {offsets = [0, 32], sizes = [8, 32], strides = [1, 1]} : vector<8x128xf32> to vector<8x32xf32>
    %404 = vector.extract_strided_slice %401 {offsets = [0, 64], sizes = [8, 32], strides = [1, 1]} : vector<8x128xf32> to vector<8x32xf32>
    %405 = vector.extract_strided_slice %401 {offsets = [0, 96], sizes = [8, 32], strides = [1, 1]} : vector<8x128xf32> to vector<8x32xf32>
    %406 = arith.mulf %403, %358 : vector<8x32xf32>
    %407 = arith.mulf %402, %404 : vector<8x32xf32>
    %408 = arith.addf %406, %407 : vector<8x32xf32>
    %409 = math.tanh %408 : vector<8x32xf32>
    %410 = arith.mulf %405, %409 : vector<8x32xf32>
    %411 = tpu.concatenate %389, %410 in 0 : vector<8x32xf32>, vector<8x32xf32> -> vector<16x32xf32>
    %412 = arith.index_cast %c7_i32 : i32 to index
    %c0_100 = arith.constant 0 : index
    %c0_101 = arith.constant 0 : index
    %413 = vector.load %arg4[%412, %c0_100, %c0_101] : memref<8x16x32xf32, #tpu.memory_space<vmem>>, vector<1x16x32xf32>
    %414 = vector.shape_cast %413 : vector<1x16x32xf32> to vector<16x32xf32>
    %415 = vector.shape_cast %411 : vector<16x32xf32> to vector<1x16x32xf32>
    tpu.vector_store %arg4[%412, %c0_100, %c0_101], %415 {strides = array<i32>} : memref<8x16x32xf32, #tpu.memory_space<vmem>>, vector<1x16x32xf32>,
    %c8_i32 = arith.constant 8 : i32
    %416 = tpu.concatenate %389, %410 in 0 : vector<8x32xf32>, vector<8x32xf32> -> vector<16x32xf32>
    %c0_102 = arith.constant 0 : index
    %c0_103 = arith.constant 0 : index
    %417 = vector.load %arg5[%c0_102, %c0_103] : memref<16x32xf32, #tpu.memory_space<vmem>>, vector<16x32xf32>
    tpu.vector_store %arg5[%c0_102, %c0_103], %416 {strides = array<i32>} : memref<16x32xf32, #tpu.memory_space<vmem>>, vector<16x32xf32>,
    %418 = tpu.concatenate %387, %408 in 0 : vector<8x32xf32>, vector<8x32xf32> -> vector<16x32xf32>
    %c0_104 = arith.constant 0 : index
    %c0_105 = arith.constant 0 : index
    %419 = vector.load %arg6[%c0_104, %c0_105] : memref<16x32xf32, #tpu.memory_space<vmem>>, vector<16x32xf32>
    tpu.vector_store %arg6[%c0_104, %c0_105], %418 {strides = array<i32>} : memref<16x32xf32, #tpu.memory_space<vmem>>, vector<16x32xf32>,
    return
  }
  func.func @transform_0(%arg0: i32, %arg1: i32) -> (i32, i32, i32) {
    %c0_i32 = arith.constant 0 : i32
    %c0_i32_0 = arith.constant 0 : i32
    return %arg1, %arg0, %c0_i32 : i32, i32, i32
  }
  func.func @transform_1(%arg0: i32, %arg1: i32) -> (i32, i32) {
    %c0_i32 = arith.constant 0 : i32
    %c0_i32_0 = arith.constant 0 : i32
    %c0_i32_1 = arith.constant 0 : i32
    return %c0_i32, %c0_i32_0 : i32, i32
  }
  func.func @transform_2(%arg0: i32, %arg1: i32) -> (i32, i32, i32) {
    %c0_i32 = arith.constant 0 : i32
    %c0_i32_0 = arith.constant 0 : i32
    return %arg1, %arg0, %c0_i32 : i32, i32, i32
  }
}

</mosaic_0001>

<bundles_post_ra>
// kernel: decoder_forward.1
= control target key start
LH: loop header
LB: loop body
LE: loop exit
PB: predicated region body
PF: predicated region fallthrough
CT: control target
= control target key end

     0   :  { %vm15_vm0 = vcmask 261120   ;;  %v2172_v0 = vmov 0.0|0.0   ;;  %v2173_v4 = vmov 0.0   ;;  %vm2174_vm1 = vmmov 0   ;;  %s2176_s21 = smov 64   ;;  %s2587_s1 = inlined_call_operand.vmem [shape: f32[32,128], index: 1, kind: input, shape index: {}]   ;;  %s2588_s0 = inlined_call_operand.vmem [shape: f32[8,16,128], index: 0, kind: input, shape index: {}]   ;;  %s2589_s2 = inlined_call_operand.vmem [shape: f32[8,16,32], index: 2, kind: output, shape index: {}]  }
   0x1   :  { %2006 = vmatprep.subr.bf16.mxu0 %v2172_v0  ;;  %2012 = vmatprep.subr.bf16.mxu1 %v2172_v0  ;;  %v20_v1 = vld [vmem:[%s2587_s1] sm:$0xff]  ;;  %v21_v2 = vld [vmem:[%s2587_s1 + $0x8] sm:$0xff]  ;;  %v22_v3 = vld [vmem:[%s2587_s1 + $0x10] sm:$0xff]  ;;  %16 = vst.msk [vmem:[#allocation2] sm:$0xff] %vm15_vm0, %v2173_v4  ;;  %v24_v12 = vlaneseq }
   0x2   :  { %17 = vst.msk [vmem:[#allocation2 + $0x8] sm:$0xff] %vm15_vm0, %v2173_v4  ;;  %18 = vst.msk [vmem:[#allocation3] sm:$0xff] %vm15_vm0, %v2173_v4  ;;  %v2212_v5 = vpack.c.bf16 %v21_v2, %v20_v1  ;;  %v23_v6 = vld [vmem:[%s2587_s1 + $0x18] sm:$0xff]  ;;  %1838 = vmatprep.mubr.msk.f32.mxu0 %vm2174_vm1, %v2173_v4  ;;  %1849 = vmatprep.mubr.msk.f32.mxu1 %vm2174_vm1, %v2173_v4  ;;  %s2175_s1 = smov 32   ;;  %v33_v14 = vld [vmem:[%s2588_s0] sm:$0xff] }
   0x3   :  { %19 = vst.msk [vmem:[#allocation3 + $0x8] sm:$0xff] %vm15_vm0, %v2173_v4  ;;  %v2223_v7 = vpack.c.bf16 %v23_v6, %v22_v3  ;;  %v25_v13 = vand.u32 127, %v24_v12  ;;  %v34_v15 = vld [vmem:[%s2588_s0 + $0x8] sm:$0xff]  ;;  %v1708_v55 = vld [vmem:[%s2588_s0 + $0x10] sm:$0xff]  ;;  %v1709_v59 = vld [vmem:[%s2588_s0 + $0x18] sm:$0xff] }
   0x4   :  { %2008 = vmatpush3.bf16.msra.mxu0 %v2212_v5  ;;  %2014 = vmatpush3.bf16.msra.mxu1 %v2212_v5 }
   0x5   :  { %2009 = vmatprep.subr.bf16.mxu0 %v2172_v0  ;;  %2015 = vmatprep.subr.bf16.mxu1 %v2172_v0  ;;  %vm26_vm2 = vcmp.ge.s32.totalorder %v25_v13, 64  ;;  %vm27_vm3 = vcmp.lt.s32.totalorder %v25_v13, 96 }
   0x6   :  { %vm2253_vm4 = vmand %vm26_vm2, %vm27_vm3 }
   0x8   :  { %2011 = vmatpush3.bf16.msra.mxu0 %v2223_v7  ;;  %2017 = vmatpush3.bf16.msra.mxu1 %v2223_v7  ;;  %v29_v8 = vld [vmem:[#allocation2] sm:$0xff] }
   0x9   :  { %v30_v9 = vld [vmem:[#allocation2 + $0x8] sm:$0xff]  ;;  %v31_v10 = vld [vmem:[#allocation3] sm:$0xff]  ;;  %2018 = vmatprep.subr.bf16.mxu0 %v2172_v0  ;;  %2024 = vmatprep.subr.bf16.mxu1 %v2172_v0 }
   0xa   :  { %117 = vrot.lane.b32.xlu1 %v31_v10, %s2175_s1  ;;  %v32_v11 = vld [vmem:[#allocation3 + $0x8] sm:$0xff] }
   0xb   :  { %1839 = vmatmul.mubr.msk.f32.vlgmr.msra.gmra.mrb[0].mxu0 %vm15_vm0, %v29_v8  ;;  %1850 = vmatmul.mubr.msk.f32.vlgmr.msra.gmra.mrb[0].mxu1 %vm15_vm0, %v30_v9 }
   0xc   :  { %2020 = vmatpush3.bf16.msra.mxu0 %v2212_v5  ;;  %2026 = vmatpush3.bf16.msra.mxu1 %v2212_v5 }
   0xd   :  { %2021 = vmatprep.subr.bf16.mxu0 %v2172_v0  ;;  %1860 = vmatprep.mubr.msk.f32.mxu0 %vm2174_vm1, %v2173_v4 }
   0xe   :  { %218 = vrot.lane.b32.xlu1 %v32_v11, %s2175_s1  ;;  %2027 = vmatprep.subr.bf16.mxu1 %v2172_v0 }
   0xf   :  { %1871 = vmatprep.mubr.msk.f32.mxu1 %vm2174_vm1, %v2173_v4 }
  0x10   :  { %2023 = vmatpush3.bf16.msra.mxu0 %v2223_v7  ;;  %2029 = vmatpush3.bf16.msra.mxu1 %v2223_v7 }
  0x11   :  { %2030 = vmatprep.subr.bf16.mxu0 %v2172_v0  ;;  %2036 = vmatprep.subr.bf16.mxu1 %v2172_v0 }
  0x7c   :  { %v118_v39 = vpop.permute.xlu1 %117 }
  0x80   :  { %v219_v41 = vpop.permute.xlu1 %218 }
  0xde   :  { %v105_v16 = vpop.f32.mrb[0].mxu0  ;;  %v206_v17 = vpop.f32.mrb[0].mxu1 }
  0xdf   :  { %v109_v18 = vadd.f32 %v105_v16, %v33_v14  ;;  %v210_v19 = vadd.f32 %v206_v17, %v34_v15  ;;  %v1840_v20 = vpop.f32.mrb[1].mxu0  ;;  %v1851_v21 = vpop.f32.mrb[1].mxu1 }
  0xe1   :  { %v110_v23 = vmul.f32 0.5, %v109_v18  ;;  %v211_v24 = vmul.f32 0.5, %v210_v19 }
  0xe3   :  { %v111_v25 = vsel %vm2253_vm4, %v109_v18, %v110_v23  ;;  %v212_v26 = vsel %vm2253_vm4, %v210_v19, %v211_v24 }
  0xe4   :  { %2108 = vtanh.f32 %v111_v25 }
  0xe5   :  { %2110 = vtanh.f32 %v212_v26 }
  0xee   :  { %v2109_v27 = vpop.eup %2108 }
  0xef   :  { %v2111_v28 = vpop.eup %2110  ;;  %v113_v29 = vadd.f32 1.0, %v2109_v27 }
  0xf0   :  { %v214_v30 = vadd.f32 1.0, %v2111_v28 }
  0xf1   :  { %v114_v31 = vmul.f32 0.5, %v113_v29 }
  0xf2   :  { %v215_v33 = vmul.f32 0.5, %v214_v30 }
  0xf3   :  { %v115_v32 = vsel %vm2253_vm4, %v2109_v27, %v114_v31 }
  0xf4   :  { %122 = vrot.lane.b32.xlu0 %v115_v32, %s2176_s21  ;;  %v216_v34 = vsel %vm2253_vm4, %v2111_v28, %v215_v33  ;;  %v120_v40 = vmul.f32 %v118_v39, %v115_v32 }
  0xf5   :  { %v221_v44 = vmul.f32 %v219_v41, %v216_v34 }
  0xf8   :  { %223 = vrot.lane.b32.xlu0 %v216_v34, %s2176_s21 }
 0x166   :  { %v123_v35 = vpop.permute.xlu0 %122 }
 0x167   :  { %v125_v36 = vmul.f32 %v123_v35, %v115_v32 }
 0x169   :  { %127 = vrot.lane.b32.xlu0 %v125_v36, %s2175_s1 }
 0x16a   :  { %v224_v37 = vpop.permute.xlu0 %223 }
 0x16b   :  { %v226_v38 = vmul.f32 %v224_v37, %v216_v34 }
 0x16d   :  { %228 = vrot.lane.b32.xlu1 %v226_v38, %s2175_s1  ;;  %v1715_v38 = vld [vmem:[%s2588_s0 + $0x28] sm:$0xff] }
 0x1db   :  { %v128_v42 = vpop.permute.xlu0 %127 }
 0x1dc   :  { %v2269_v43 = vadd.f32 %v128_v42, %v120_v40 }
 0x1de   :  { %2112 = vtanh.f32 %v2269_v43 }
 0x1df   :  { %v229_v45 = vpop.permute.xlu1 %228 }
 0x1e0   :  { %v2272_v46 = vadd.f32 %v229_v45, %v221_v44 }
 0x1e2   :  { %2114 = vtanh.f32 %v2272_v46 }
 0x1e8   :  { %v2113_v47 = vpop.eup %2112 }
 0x1e9   :  { %133 = vrot.lane.b32.xlu0 %v2113_v47, %s2176_s21 }
 0x1ec   :  { %v2115_v48 = vpop.eup %2114 }
 0x1ed   :  { %234 = vrot.lane.b32.xlu1 %v2115_v48, %s2176_s21 }
 0x25b   :  { %v134_v49 = vpop.permute.xlu0 %133 }
 0x25c   :  { %v136_v50 = vmul.f32 %v134_v49, %v115_v32 }
 0x25e   :  { %240 = vrot.lane.b32.xlu0 %v136_v50, %s2175_s1 }
 0x25f   :  { %v235_v51 = vpop.permute.xlu1 %234 }
 0x260   :  { %v237_v52 = vmul.f32 %v235_v51, %v216_v34  ;;  %v1714_v34 = vld [vmem:[%s2588_s0 + $0x20] sm:$0xff] }
 0x262   :  { %242 = vrot.lane.b32.xlu1 %v237_v52, %s2175_s1 }
 0x2d0   :  { %v241_v53 = vpop.permute.xlu0 %240 }
 0x2d1   :  { %246 = vst.msk [vmem:[%s2589_s2] sm:$0xff] %vm15_vm0, %v241_v53  ;;  %1861 = vmatmul.mubr.msk.f32.vlgmr.msra.gmra.mrb[2].mxu0 %vm15_vm0, %v241_v53 }
 0x2d2   :  { %2032 = vmatpush3.bf16.msra.mxu0 %v2212_v5  ;;  %1882 = vmatprep.mubr.msk.f32.mxu0 %vm2174_vm1, %v2173_v4 }
 0x2d3   :  { %2033 = vmatprep.subr.bf16.mxu0 %v2172_v0 }
 0x2d4   :  { %v243_v54 = vpop.permute.xlu1 %242 }
 0x2d5   :  { %247 = vst.msk [vmem:[%s2589_s2 + $0x8] sm:$0xff] %vm15_vm0, %v243_v54  ;;  %1872 = vmatmul.mubr.msk.f32.vlgmr.msra.gmra.mrb[2].mxu1 %vm15_vm0, %v243_v54 }
 0x2d6   :  { %2035 = vmatpush3.bf16.msra.mxu0 %v2223_v7  ;;  %2038 = vmatpush3.bf16.msra.mxu1 %v2212_v5 }
 0x2d7   :  { %2039 = vmatprep.subr.bf16.mxu1 %v2172_v0  ;;  %1893 = vmatprep.mubr.msk.f32.mxu1 %vm2174_vm1, %v2173_v4 }
 0x2d8   :  { %2042 = vmatprep.subr.bf16.mxu0 %v2172_v0 }
 0x2da   :  { %2041 = vmatpush3.bf16.msra.mxu1 %v2223_v7 }
 0x2db   :  { %2048 = vmatprep.subr.bf16.mxu1 %v2172_v0 }
 0x3a4   :  { %v319_v56 = vpop.f32.mrb[2].mxu0 }
 0x3a5   :  { %v323_v57 = vadd.f32 %v1708_v55, %v319_v56  ;;  %v1862_v58 = vpop.f32.mrb[3].mxu0 }
 0x3a7   :  { %v324_v60 = vmul.f32 0.5, %v323_v57 }
 0x3a8   :  { %v415_v61 = vpop.f32.mrb[2].mxu1 }
 0x3a9   :  { %v325_v62 = vsel %vm2253_vm4, %v323_v57, %v324_v60  ;;  %v419_v63 = vadd.f32 %v1709_v59, %v415_v61  ;;  %v1873_v1 = vpop.f32.mrb[3].mxu1 }
 0x3aa   :  { %2116 = vtanh.f32 %v325_v62 }
 0x3ab   :  { %v420_v2 = vmul.f32 0.5, %v419_v63 }
 0x3ad   :  { %v421_v3 = vsel %vm2253_vm4, %v419_v63, %v420_v2 }
 0x3ae   :  { %2118 = vtanh.f32 %v421_v3 }
 0x3b4   :  { %v2117_v6 = vpop.eup %2116 }
 0x3b5   :  { %v327_v8 = vadd.f32 1.0, %v2117_v6 }
 0x3b7   :  { %v328_v9 = vmul.f32 0.5, %v327_v8 }
 0x3b8   :  { %v2119_v10 = vpop.eup %2118 }
 0x3b9   :  { %v329_v11 = vsel %vm2253_vm4, %v2117_v6, %v328_v9  ;;  %v423_v12 = vadd.f32 1.0, %v2119_v10 }
 0x3ba   :  { %332 = vrot.lane.b32.xlu0 %v329_v11, %s2176_s21  ;;  %v330_v19 = vmul.f32 %v329_v11, %v2269_v43 }
 0x3bb   :  { %v424_v13 = vmul.f32 0.5, %v423_v12  ;;  %v1720_v12 = vld [vmem:[%s2588_s0 + $0x30] sm:$0xff] }
 0x3bd   :  { %v425_v14 = vsel %vm2253_vm4, %v2119_v10, %v424_v13 }
 0x3be   :  { %428 = vrot.lane.b32.xlu1 %v425_v14, %s2176_s21  ;;  %v426_v23 = vmul.f32 %v425_v14, %v2272_v46 }
 0x42c   :  { %v333_v15 = vpop.permute.xlu0 %332 }
 0x42d   :  { %v335_v16 = vmul.f32 %v333_v15, %v329_v11 }
 0x42f   :  { %337 = vrot.lane.b32.xlu0 %v335_v16, %s2175_s1  ;;  %v1721_v16 = vld [vmem:[%s2588_s0 + $0x38] sm:$0xff] }
 0x430   :  { %v429_v17 = vpop.permute.xlu1 %428 }
 0x431   :  { %v431_v18 = vmul.f32 %v429_v17, %v425_v14 }
 0x433   :  { %433 = vrot.lane.b32.xlu1 %v431_v18, %s2175_s1 }
 0x4a1   :  { %v338_v20 = vpop.permute.xlu0 %337 }
 0x4a2   :  { %v340_v21 = vadd.f32 %v338_v20, %v330_v19 }
 0x4a4   :  { %2120 = vtanh.f32 %v340_v21 }
 0x4a5   :  { %v434_v24 = vpop.permute.xlu1 %433 }
 0x4a6   :  { %v436_v25 = vadd.f32 %v434_v24, %v426_v23 }
 0x4a8   :  { %2122 = vtanh.f32 %v436_v25 }
 0x4ae   :  { %v2121_v26 = vpop.eup %2120 }
 0x4af   :  { %343 = vrot.lane.b32.xlu0 %v2121_v26, %s2176_s21 }
 0x4b2   :  { %v2123_v27 = vpop.eup %2122 }
 0x4b3   :  { %439 = vrot.lane.b32.xlu1 %v2123_v27, %s2176_s21 }
 0x521   :  { %v344_v28 = vpop.permute.xlu0 %343 }
 0x522   :  { %v346_v29 = vmul.f32 %v344_v28, %v329_v11 }
 0x524   :  { %445 = vrot.lane.b32.xlu0 %v346_v29, %s2175_s1 }
 0x525   :  { %v440_v30 = vpop.permute.xlu1 %439 }
 0x526   :  { %v442_v31 = vmul.f32 %v440_v30, %v425_v14 }
 0x528   :  { %447 = vrot.lane.b32.xlu1 %v442_v31, %s2175_s1 }
 0x596   :  { %v446_v32 = vpop.permute.xlu0 %445 }
 0x597   :  { %1712 = vst.msk [vmem:[%s2589_s2 + $0x10] sm:$0xff] %vm15_vm0, %v446_v32  ;;  %1883 = vmatmul.mubr.msk.f32.vlgmr.msra.gmra.mrb[4].mxu0 %vm15_vm0, %v446_v32 }
 0x598   :  { %2044 = vmatpush3.bf16.msra.mxu0 %v2212_v5  ;;  %1904 = vmatprep.mubr.msk.f32.mxu0 %vm2174_vm1, %v2173_v4 }
 0x599   :  { %2045 = vmatprep.subr.bf16.mxu0 %v2172_v0 }
 0x59a   :  { %v448_v33 = vpop.permute.xlu1 %447 }
 0x59b   :  { %1713 = vst.msk [vmem:[%s2589_s2 + $0x18] sm:$0xff] %vm15_vm0, %v448_v33  ;;  %1894 = vmatmul.mubr.msk.f32.vlgmr.msra.gmra.mrb[4].mxu1 %vm15_vm0, %v448_v33 }
 0x59c   :  { %2047 = vmatpush3.bf16.msra.mxu0 %v2223_v7  ;;  %2050 = vmatpush3.bf16.msra.mxu1 %v2212_v5 }
 0x59d   :  { %2051 = vmatprep.subr.bf16.mxu1 %v2172_v0  ;;  %1915 = vmatprep.mubr.msk.f32.mxu1 %vm2174_vm1, %v2173_v4 }
 0x59e   :  { %2054 = vmatprep.subr.bf16.mxu0 %v2172_v0 }
 0x5a0   :  { %2053 = vmatpush3.bf16.msra.mxu1 %v2223_v7 }
 0x5a1   :  { %2060 = vmatprep.subr.bf16.mxu1 %v2172_v0 }
 0x66a   :  { %v525_v35 = vpop.f32.mrb[4].mxu0 }
 0x66b   :  { %v529_v36 = vadd.f32 %v1714_v34, %v525_v35  ;;  %v1884_v37 = vpop.f32.mrb[5].mxu0 }
 0x66d   :  { %v530_v39 = vmul.f32 0.5, %v529_v36 }
 0x66e   :  { %v621_v40 = vpop.f32.mrb[4].mxu1 }
 0x66f   :  { %v531_v41 = vsel %vm2253_vm4, %v529_v36, %v530_v39  ;;  %v625_v42 = vadd.f32 %v1715_v38, %v621_v40  ;;  %v1895_v43 = vpop.f32.mrb[5].mxu1 }
 0x670   :  { %2124 = vtanh.f32 %v531_v41 }
 0x671   :  { %v626_v44 = vmul.f32 0.5, %v625_v42 }
 0x673   :  { %v627_v45 = vsel %vm2253_vm4, %v625_v42, %v626_v44 }
 0x674   :  { %2126 = vtanh.f32 %v627_v45 }
 0x67a   :  { %v2125_v46 = vpop.eup %2124 }
 0x67b   :  { %v533_v47 = vadd.f32 1.0, %v2125_v46 }
 0x67d   :  { %v534_v48 = vmul.f32 0.5, %v533_v47 }
 0x67e   :  { %v2127_v49 = vpop.eup %2126 }
 0x67f   :  { %v535_v50 = vsel %vm2253_vm4, %v2125_v46, %v534_v48  ;;  %v629_v51 = vadd.f32 1.0, %v2127_v49 }
 0x680   :  { %538 = vrot.lane.b32.xlu0 %v535_v50, %s2176_s21  ;;  %v536_v58 = vmul.f32 %v535_v50, %v340_v21 }
 0x681   :  { %v630_v52 = vmul.f32 0.5, %v629_v51  ;;  %v1726_v51 = vld [vmem:[%s2588_s0 + $0x40] sm:$0xff] }
 0x683   :  { %v631_v53 = vsel %vm2253_vm4, %v2127_v49, %v630_v52 }
 0x684   :  { %634 = vrot.lane.b32.xlu1 %v631_v53, %s2176_s21  ;;  %v632_v61 = vmul.f32 %v631_v53, %v436_v25 }
 0x6f2   :  { %v539_v54 = vpop.permute.xlu0 %538 }
 0x6f3   :  { %v541_v55 = vmul.f32 %v539_v54, %v535_v50 }
 0x6f5   :  { %543 = vrot.lane.b32.xlu0 %v541_v55, %s2175_s1  ;;  %v1727_v55 = vld [vmem:[%s2588_s0 + $0x48] sm:$0xff] }
 0x6f6   :  { %v635_v56 = vpop.permute.xlu1 %634 }
 0x6f7   :  { %v637_v57 = vmul.f32 %v635_v56, %v631_v53 }
 0x6f9   :  { %639 = vrot.lane.b32.xlu1 %v637_v57, %s2175_s1 }
 0x767   :  { %v544_v59 = vpop.permute.xlu0 %543 }
 0x768   :  { %v546_v60 = vadd.f32 %v544_v59, %v536_v58 }
 0x76a   :  { %2128 = vtanh.f32 %v546_v60 }
 0x76b   :  { %v640_v62 = vpop.permute.xlu1 %639 }
 0x76c   :  { %v642_v63 = vadd.f32 %v640_v62, %v632_v61 }
 0x76e   :  { %2130 = vtanh.f32 %v642_v63 }
 0x774   :  { %v2129_v1 = vpop.eup %2128 }
 0x775   :  { %549 = vrot.lane.b32.xlu0 %v2129_v1, %s2176_s21 }
 0x778   :  { %v2131_v2 = vpop.eup %2130 }
 0x779   :  { %645 = vrot.lane.b32.xlu1 %v2131_v2, %s2176_s21 }
 0x7e7   :  { %v550_v3 = vpop.permute.xlu0 %549 }
 0x7e8   :  { %v552_v6 = vmul.f32 %v550_v3, %v535_v50 }
 0x7ea   :  { %651 = vrot.lane.b32.xlu0 %v552_v6, %s2175_s1 }
 0x7eb   :  { %v646_v8 = vpop.permute.xlu1 %645 }
 0x7ec   :  { %v648_v9 = vmul.f32 %v646_v8, %v631_v53 }
 0x7ee   :  { %653 = vrot.lane.b32.xlu1 %v648_v9, %s2175_s1 }
 0x85c   :  { %v652_v10 = vpop.permute.xlu0 %651 }
 0x85d   :  { %1718 = vst.msk [vmem:[%s2589_s2 + $0x20] sm:$0xff] %vm15_vm0, %v652_v10  ;;  %1905 = vmatmul.mubr.msk.f32.vlgmr.msra.gmra.mrb[6].mxu0 %vm15_vm0, %v652_v10 }
 0x85e   :  { %2056 = vmatpush3.bf16.msra.mxu0 %v2212_v5  ;;  %1926 = vmatprep.mubr.msk.f32.mxu0 %vm2174_vm1, %v2173_v4 }
 0x85f   :  { %2057 = vmatprep.subr.bf16.mxu0 %v2172_v0 }
 0x860   :  { %v654_v11 = vpop.permute.xlu1 %653 }
 0x861   :  { %1719 = vst.msk [vmem:[%s2589_s2 + $0x28] sm:$0xff] %vm15_vm0, %v654_v11  ;;  %1916 = vmatmul.mubr.msk.f32.vlgmr.msra.gmra.mrb[6].mxu1 %vm15_vm0, %v654_v11 }
 0x862   :  { %2059 = vmatpush3.bf16.msra.mxu0 %v2223_v7  ;;  %2062 = vmatpush3.bf16.msra.mxu1 %v2212_v5 }
 0x863   :  { %2063 = vmatprep.subr.bf16.mxu1 %v2172_v0  ;;  %1937 = vmatprep.mubr.msk.f32.mxu1 %vm2174_vm1, %v2173_v4 }
 0x864   :  { %2066 = vmatprep.subr.bf16.mxu0 %v2172_v0 }
 0x866   :  { %2065 = vmatpush3.bf16.msra.mxu1 %v2223_v7 }
 0x867   :  { %2072 = vmatprep.subr.bf16.mxu1 %v2172_v0 }
 0x930   :  { %v731_v13 = vpop.f32.mrb[6].mxu0 }
 0x931   :  { %v735_v14 = vadd.f32 %v1720_v12, %v731_v13  ;;  %v1906_v15 = vpop.f32.mrb[7].mxu0 }
 0x933   :  { %v736_v17 = vmul.f32 0.5, %v735_v14 }
 0x934   :  { %v827_v18 = vpop.f32.mrb[6].mxu1 }
 0x935   :  { %v737_v19 = vsel %vm2253_vm4, %v735_v14, %v736_v17  ;;  %v831_v20 = vadd.f32 %v1721_v16, %v827_v18  ;;  %v1917_v21 = vpop.f32.mrb[7].mxu1 }
 0x936   :  { %2132 = vtanh.f32 %v737_v19 }
 0x937   :  { %v832_v23 = vmul.f32 0.5, %v831_v20 }
 0x939   :  { %v833_v24 = vsel %vm2253_vm4, %v831_v20, %v832_v23 }
 0x93a   :  { %2134 = vtanh.f32 %v833_v24 }
 0x940   :  { %v2133_v25 = vpop.eup %2132 }
 0x941   :  { %v739_v26 = vadd.f32 1.0, %v2133_v25 }
 0x943   :  { %v740_v27 = vmul.f32 0.5, %v739_v26 }
 0x944   :  { %v2135_v28 = vpop.eup %2134 }
 0x945   :  { %v741_v29 = vsel %vm2253_vm4, %v2133_v25, %v740_v27  ;;  %v835_v30 = vadd.f32 1.0, %v2135_v28 }
 0x946   :  { %744 = vrot.lane.b32.xlu0 %v741_v29, %s2176_s21  ;;  %v742_v37 = vmul.f32 %v741_v29, %v546_v60 }
 0x947   :  { %v836_v31 = vmul.f32 0.5, %v835_v30  ;;  %v1732_v30 = vld [vmem:[%s2588_s0 + $0x50] sm:$0xff] }
 0x949   :  { %v837_v32 = vsel %vm2253_vm4, %v2135_v28, %v836_v31 }
 0x94a   :  { %840 = vrot.lane.b32.xlu1 %v837_v32, %s2176_s21  ;;  %v838_v40 = vmul.f32 %v837_v32, %v642_v63 }
 0x9b8   :  { %v745_v33 = vpop.permute.xlu0 %744 }
 0x9b9   :  { %v747_v34 = vmul.f32 %v745_v33, %v741_v29 }
 0x9bb   :  { %749 = vrot.lane.b32.xlu0 %v747_v34, %s2175_s1  ;;  %v1733_v34 = vld [vmem:[%s2588_s0 + $0x58] sm:$0xff] }
 0x9bc   :  { %v841_v35 = vpop.permute.xlu1 %840 }
 0x9bd   :  { %v843_v36 = vmul.f32 %v841_v35, %v837_v32 }
 0x9bf   :  { %845 = vrot.lane.b32.xlu1 %v843_v36, %s2175_s1 }
 0xa2d   :  { %v750_v38 = vpop.permute.xlu0 %749 }
 0xa2e   :  { %v752_v39 = vadd.f32 %v750_v38, %v742_v37 }
 0xa30   :  { %2136 = vtanh.f32 %v752_v39 }
 0xa31   :  { %v846_v41 = vpop.permute.xlu1 %845 }
 0xa32   :  { %v848_v42 = vadd.f32 %v846_v41, %v838_v40 }
 0xa34   :  { %2138 = vtanh.f32 %v848_v42 }
 0xa3a   :  { %v2137_v43 = vpop.eup %2136 }
 0xa3b   :  { %755 = vrot.lane.b32.xlu0 %v2137_v43, %s2176_s21 }
 0xa3e   :  { %v2139_v44 = vpop.eup %2138 }
 0xa3f   :  { %851 = vrot.lane.b32.xlu1 %v2139_v44, %s2176_s21 }
 0xaad   :  { %v756_v45 = vpop.permute.xlu0 %755 }
 0xaae   :  { %v758_v46 = vmul.f32 %v756_v45, %v741_v29 }
 0xab0   :  { %857 = vrot.lane.b32.xlu0 %v758_v46, %s2175_s1 }
 0xab1   :  { %v852_v47 = vpop.permute.xlu1 %851 }
 0xab2   :  { %v854_v48 = vmul.f32 %v852_v47, %v837_v32 }
 0xab4   :  { %859 = vrot.lane.b32.xlu1 %v854_v48, %s2175_s1 }
 0xb22   :  { %v858_v49 = vpop.permute.xlu0 %857 }
 0xb23   :  { %1724 = vst.msk [vmem:[%s2589_s2 + $0x30] sm:$0xff] %vm15_vm0, %v858_v49  ;;  %1927 = vmatmul.mubr.msk.f32.vlgmr.msra.gmra.mrb[8].mxu0 %vm15_vm0, %v858_v49 }
 0xb24   :  { %2068 = vmatpush3.bf16.msra.mxu0 %v2212_v5  ;;  %1948 = vmatprep.mubr.msk.f32.mxu0 %vm2174_vm1, %v2173_v4 }
 0xb25   :  { %2069 = vmatprep.subr.bf16.mxu0 %v2172_v0 }
 0xb26   :  { %v860_v50 = vpop.permute.xlu1 %859 }
 0xb27   :  { %1725 = vst.msk [vmem:[%s2589_s2 + $0x38] sm:$0xff] %vm15_vm0, %v860_v50  ;;  %1938 = vmatmul.mubr.msk.f32.vlgmr.msra.gmra.mrb[8].mxu1 %vm15_vm0, %v860_v50 }
 0xb28   :  { %2071 = vmatpush3.bf16.msra.mxu0 %v2223_v7  ;;  %2074 = vmatpush3.bf16.msra.mxu1 %v2212_v5 }
 0xb29   :  { %2075 = vmatprep.subr.bf16.mxu1 %v2172_v0  ;;  %1959 = vmatprep.mubr.msk.f32.mxu1 %vm2174_vm1, %v2173_v4 }
 0xb2a   :  { %2078 = vmatprep.subr.bf16.mxu0 %v2172_v0 }
 0xb2c   :  { %2077 = vmatpush3.bf16.msra.mxu1 %v2223_v7 }
 0xb2d   :  { %2084 = vmatprep.subr.bf16.mxu1 %v2172_v0 }
 0xbf6   :  { %v937_v52 = vpop.f32.mrb[8].mxu0 }
 0xbf7   :  { %v941_v53 = vadd.f32 %v1726_v51, %v937_v52  ;;  %v1928_v54 = vpop.f32.mrb[9].mxu0 }
 0xbf9   :  { %v942_v56 = vmul.f32 0.5, %v941_v53 }
 0xbfa   :  { %v1033_v57 = vpop.f32.mrb[8].mxu1 }
 0xbfb   :  { %v943_v58 = vsel %vm2253_vm4, %v941_v53, %v942_v56  ;;  %v1037_v59 = vadd.f32 %v1727_v55, %v1033_v57  ;;  %v1939_v60 = vpop.f32.mrb[9].mxu1 }
 0xbfc   :  { %2140 = vtanh.f32 %v943_v58 }
 0xbfd   :  { %v1038_v61 = vmul.f32 0.5, %v1037_v59 }
 0xbff   :  { %v1039_v62 = vsel %vm2253_vm4, %v1037_v59, %v1038_v61 }
 0xc00   :  { %2142 = vtanh.f32 %v1039_v62 }
 0xc06   :  { %v2141_v63 = vpop.eup %2140 }
 0xc07   :  { %v945_v1 = vadd.f32 1.0, %v2141_v63 }
 0xc09   :  { %v946_v2 = vmul.f32 0.5, %v945_v1 }
 0xc0a   :  { %v2143_v3 = vpop.eup %2142 }
 0xc0b   :  { %v947_v6 = vsel %vm2253_vm4, %v2141_v63, %v946_v2  ;;  %v1041_v8 = vadd.f32 1.0, %v2143_v3 }
 0xc0c   :  { %950 = vrot.lane.b32.xlu0 %v947_v6, %s2176_s21  ;;  %v948_v15 = vmul.f32 %v947_v6, %v752_v39 }
 0xc0d   :  { %v1042_v9 = vmul.f32 0.5, %v1041_v8  ;;  %v1738_v8 = vld [vmem:[%s2588_s0 + $0x60] sm:$0xff] }
 0xc0f   :  { %v1043_v10 = vsel %vm2253_vm4, %v2143_v3, %v1042_v9 }
 0xc10   :  { %1046 = vrot.lane.b32.xlu1 %v1043_v10, %s2176_s21  ;;  %v1044_v18 = vmul.f32 %v1043_v10, %v848_v42 }
 0xc7e   :  { %v951_v11 = vpop.permute.xlu0 %950 }
 0xc7f   :  { %v953_v12 = vmul.f32 %v951_v11, %v947_v6 }
 0xc81   :  { %955 = vrot.lane.b32.xlu0 %v953_v12, %s2175_s1  ;;  %v1739_v12 = vld [vmem:[%s2588_s0 + $0x68] sm:$0xff] }
 0xc82   :  { %v1047_v13 = vpop.permute.xlu1 %1046 }
 0xc83   :  { %v1049_v14 = vmul.f32 %v1047_v13, %v1043_v10 }
 0xc85   :  { %1051 = vrot.lane.b32.xlu1 %v1049_v14, %s2175_s1 }
 0xcf3   :  { %v956_v16 = vpop.permute.xlu0 %955 }
 0xcf4   :  { %v958_v17 = vadd.f32 %v956_v16, %v948_v15 }
 0xcf6   :  { %2144 = vtanh.f32 %v958_v17 }
 0xcf7   :  { %v1052_v19 = vpop.permute.xlu1 %1051 }
 0xcf8   :  { %v1054_v20 = vadd.f32 %v1052_v19, %v1044_v18 }
 0xcfa   :  { %2146 = vtanh.f32 %v1054_v20 }
 0xd00   :  { %v2145_v21 = vpop.eup %2144 }
 0xd01   :  { %961 = vrot.lane.b32.xlu0 %v2145_v21, %s2176_s21 }
 0xd04   :  { %v2147_v23 = vpop.eup %2146 }
 0xd05   :  { %1057 = vrot.lane.b32.xlu1 %v2147_v23, %s2176_s21 }
 0xd73   :  { %v962_v24 = vpop.permute.xlu0 %961 }
 0xd74   :  { %v964_v25 = vmul.f32 %v962_v24, %v947_v6 }
 0xd76   :  { %1063 = vrot.lane.b32.xlu0 %v964_v25, %s2175_s1 }
 0xd77   :  { %v1058_v26 = vpop.permute.xlu1 %1057 }
 0xd78   :  { %v1060_v27 = vmul.f32 %v1058_v26, %v1043_v10 }
 0xd7a   :  { %1065 = vrot.lane.b32.xlu1 %v1060_v27, %s2175_s1 }
 0xde8   :  { %v1064_v28 = vpop.permute.xlu0 %1063 }
 0xde9   :  { %1730 = vst.msk [vmem:[%s2589_s2 + $0x40] sm:$0xff] %vm15_vm0, %v1064_v28  ;;  %1949 = vmatmul.mubr.msk.f32.vlgmr.msra.gmra.mrb[10].mxu0 %vm15_vm0, %v1064_v28 }
 0xdea   :  { %2080 = vmatpush3.bf16.msra.mxu0 %v2212_v5  ;;  %1970 = vmatprep.mubr.msk.f32.mxu0 %vm2174_vm1, %v2173_v4 }
 0xdeb   :  { %2081 = vmatprep.subr.bf16.mxu0 %v2172_v0 }
 0xdec   :  { %v1066_v29 = vpop.permute.xlu1 %1065 }
 0xded   :  { %1731 = vst.msk [vmem:[%s2589_s2 + $0x48] sm:$0xff] %vm15_vm0, %v1066_v29  ;;  %1960 = vmatmul.mubr.msk.f32.vlgmr.msra.gmra.mrb[10].mxu1 %vm15_vm0, %v1066_v29 }
 0xdee   :  { %2083 = vmatpush3.bf16.msra.mxu0 %v2223_v7  ;;  %2086 = vmatpush3.bf16.msra.mxu1 %v2212_v5 }
 0xdef   :  { %2087 = vmatprep.subr.bf16.mxu1 %v2172_v0  ;;  %1981 = vmatprep.mubr.msk.f32.mxu1 %vm2174_vm1, %v2173_v4 }
 0xdf0   :  { %2090 = vmatprep.subr.bf16.mxu0 %v2172_v0 }
 0xdf2   :  { %2089 = vmatpush3.bf16.msra.mxu1 %v2223_v7 }
 0xdf3   :  { %2096 = vmatprep.subr.bf16.mxu1 %v2172_v0 }
 0xebc   :  { %v1143_v31 = vpop.f32.mrb[10].mxu0 }
 0xebd   :  { %v1147_v32 = vadd.f32 %v1732_v30, %v1143_v31  ;;  %v1950_v33 = vpop.f32.mrb[11].mxu0 }
 0xebf   :  { %v1148_v35 = vmul.f32 0.5, %v1147_v32 }
 0xec0   :  { %v1239_v36 = vpop.f32.mrb[10].mxu1 }
 0xec1   :  { %v1149_v37 = vsel %vm2253_vm4, %v1147_v32, %v1148_v35  ;;  %v1243_v38 = vadd.f32 %v1733_v34, %v1239_v36  ;;  %v1961_v39 = vpop.f32.mrb[11].mxu1 }
 0xec2   :  { %2148 = vtanh.f32 %v1149_v37 }
 0xec3   :  { %v1244_v40 = vmul.f32 0.5, %v1243_v38 }
 0xec5   :  { %v1245_v41 = vsel %vm2253_vm4, %v1243_v38, %v1244_v40 }
 0xec6   :  { %2150 = vtanh.f32 %v1245_v41 }
 0xecc   :  { %v2149_v42 = vpop.eup %2148 }
 0xecd   :  { %v1151_v43 = vadd.f32 1.0, %v2149_v42 }
 0xecf   :  { %v1152_v44 = vmul.f32 0.5, %v1151_v43  ;;  %v1744_v43 = vld [vmem:[%s2588_s0 + $0x70] sm:$0xff] }
 0xed0   :  { %v2151_v45 = vpop.eup %2150 }
 0xed1   :  { %v1153_v46 = vsel %vm2253_vm4, %v2149_v42, %v1152_v44  ;;  %v1247_v47 = vadd.f32 1.0, %v2151_v45 }
 0xed2   :  { %1156 = vrot.lane.b32.xlu0 %v1153_v46, %s2176_s21  ;;  %v1154_v54 = vmul.f32 %v1153_v46, %v958_v17 }
 0xed3   :  { %v1248_v48 = vmul.f32 0.5, %v1247_v47  ;;  %v1745_v47 = vld [vmem:[%s2588_s0 + $0x78] sm:$0xff]  ;;  %s2177_s0 = smov 96  }
 0xed5   :  { %v1249_v49 = vsel %vm2253_vm4, %v2151_v45, %v1248_v48 }
 0xed6   :  { %1252 = vrot.lane.b32.xlu1 %v1249_v49, %s2176_s21  ;;  %v1250_v57 = vmul.f32 %v1249_v49, %v1054_v20 }
 0xf44   :  { %v1157_v50 = vpop.permute.xlu0 %1156 }
 0xf45   :  { %v1159_v51 = vmul.f32 %v1157_v50, %v1153_v46 }
 0xf47   :  { %1161 = vrot.lane.b32.xlu0 %v1159_v51, %s2175_s1 }
 0xf48   :  { %v1253_v52 = vpop.permute.xlu1 %1252 }
 0xf49   :  { %v1255_v53 = vmul.f32 %v1253_v52, %v1249_v49 }
 0xf4b   :  { %1257 = vrot.lane.b32.xlu1 %v1255_v53, %s2175_s1 }
 0xfb9   :  { %v1162_v55 = vpop.permute.xlu0 %1161 }
 0xfba   :  { %v1164_v56 = vadd.f32 %v1162_v55, %v1154_v54 }
 0xfbc   :  { %2152 = vtanh.f32 %v1164_v56 }
 0xfbd   :  { %v1258_v58 = vpop.permute.xlu1 %1257 }
 0xfbe   :  { %v1260_v59 = vadd.f32 %v1258_v58, %v1250_v57 }
 0xfc0   :  { %2154 = vtanh.f32 %v1260_v59 }
 0xfc6   :  { %v2153_v60 = vpop.eup %2152 }
 0xfc7   :  { %1167 = vrot.lane.b32.xlu0 %v2153_v60, %s2176_s21 }
 0xfca   :  { %v2155_v61 = vpop.eup %2154 }
 0xfcb   :  { %1263 = vrot.lane.b32.xlu1 %v2155_v61, %s2176_s21 }
0x1039   :  { %v1168_v62 = vpop.permute.xlu0 %1167 }
0x103a   :  { %v1170_v63 = vmul.f32 %v1168_v62, %v1153_v46 }
0x103c   :  { %1269 = vrot.lane.b32.xlu0 %v1170_v63, %s2175_s1 }
0x103d   :  { %v1264_v1 = vpop.permute.xlu1 %1263 }
0x103e   :  { %v1266_v2 = vmul.f32 %v1264_v1, %v1249_v49 }
0x1040   :  { %1271 = vrot.lane.b32.xlu1 %v1266_v2, %s2175_s1 }
0x10ae   :  { %v1270_v3 = vpop.permute.xlu0 %1269 }
0x10af   :  { %1736 = vst.msk [vmem:[%s2589_s2 + $0x50] sm:$0xff] %vm15_vm0, %v1270_v3  ;;  %1971 = vmatmul.mubr.msk.f32.vlgmr.msra.gmra.mrb[12].mxu0 %vm15_vm0, %v1270_v3 }
0x10b0   :  { %2092 = vmatpush3.bf16.msra.mxu0 %v2212_v5  ;;  %1992 = vmatprep.mubr.msk.f32.mxu0 %vm2174_vm1, %v2173_v4 }
0x10b1   :  { %2093 = vmatprep.subr.bf16.mxu0 %v2172_v0 }
0x10b2   :  { %v1272_v6 = vpop.permute.xlu1 %1271 }
0x10b3   :  { %1737 = vst.msk [vmem:[%s2589_s2 + $0x58] sm:$0xff] %vm15_vm0, %v1272_v6  ;;  %1982 = vmatmul.mubr.msk.f32.vlgmr.msra.gmra.mrb[12].mxu1 %vm15_vm0, %v1272_v6 }
0x10b4   :  { %2095 = vmatpush3.bf16.msra.mxu0 %v2223_v7  ;;  %2098 = vmatpush3.bf16.msra.mxu1 %v2212_v5 }
0x10b5   :  { %2099 = vmatprep.subr.bf16.mxu1 %v2172_v0  ;;  %2003 = vmatprep.mubr.msk.f32.mxu1 %vm2174_vm1, %v2173_v4 }
0x10b8   :  { %2101 = vmatpush3.bf16.msra.mxu1 %v2223_v7 }
0x1182   :  { %v1349_v9 = vpop.f32.mrb[12].mxu0 }
0x1183   :  { %v1353_v10 = vadd.f32 %v1738_v8, %v1349_v9  ;;  %v1972_v11 = vpop.f32.mrb[13].mxu0 }
0x1185   :  { %v1354_v13 = vmul.f32 0.5, %v1353_v10 }
0x1186   :  { %v1445_v5 = vpop.f32.mrb[12].mxu1 }
0x1187   :  { %v1355_v0 = vsel %vm2253_vm4, %v1353_v10, %v1354_v13  ;;  %v1449_v14 = vadd.f32 %v1739_v12, %v1445_v5  ;;  %v1983_v4 = vpop.f32.mrb[13].mxu1 }
0x1188   :  { %2156 = vtanh.f32 %v1355_v0 }
0x1189   :  { %v1450_v7 = vmul.f32 0.5, %v1449_v14 }
0x118b   :  { %v1451_v15 = vsel %vm2253_vm4, %v1449_v14, %v1450_v7 }
0x118c   :  { %2158 = vtanh.f32 %v1451_v15 }
0x1192   :  { %v2157_v16 = vpop.eup %2156 }
0x1193   :  { %v1357_v17 = vadd.f32 1.0, %v2157_v16 }
0x1195   :  { %v1358_v18 = vmul.f32 0.5, %v1357_v17 }
0x1196   :  { %v2159_v19 = vpop.eup %2158 }
0x1197   :  { %v1359_v20 = vsel %vm2253_vm4, %v2157_v16, %v1358_v18  ;;  %v1453_v21 = vadd.f32 1.0, %v2159_v19 }
0x1198   :  { %1362 = vrot.lane.b32.xlu0 %v1359_v20, %s2176_s21  ;;  %v1360_v29 = vmul.f32 %v1359_v20, %v1164_v56 }
0x1199   :  { %v1454_v23 = vmul.f32 0.5, %v1453_v21 }
0x119b   :  { %v1455_v24 = vsel %vm2253_vm4, %v2159_v19, %v1454_v23 }
0x119c   :  { %1458 = vrot.lane.b32.xlu1 %v1455_v24, %s2176_s21  ;;  %v1456_v32 = vmul.f32 %v1455_v24, %v1260_v59 }
0x120a   :  { %v1363_v25 = vpop.permute.xlu0 %1362 }
0x120b   :  { %v1365_v26 = vmul.f32 %v1363_v25, %v1359_v20 }
0x120d   :  { %1367 = vrot.lane.b32.xlu0 %v1365_v26, %s2175_s1 }
0x120e   :  { %v1459_v27 = vpop.permute.xlu1 %1458 }
0x120f   :  { %v1461_v28 = vmul.f32 %v1459_v27, %v1455_v24 }
0x1211   :  { %1463 = vrot.lane.b32.xlu1 %v1461_v28, %s2175_s1 }
0x127f   :  { %v1368_v30 = vpop.permute.xlu0 %1367 }
0x1280   :  { %v1370_v31 = vadd.f32 %v1368_v30, %v1360_v29 }
0x1282   :  { %2160 = vtanh.f32 %v1370_v31 }
0x1283   :  { %v1464_v33 = vpop.permute.xlu1 %1463 }
0x1284   :  { %v1466_v34 = vadd.f32 %v1464_v33, %v1456_v32 }
0x1286   :  { %2162 = vtanh.f32 %v1466_v34 }
0x128c   :  { %v2161_v35 = vpop.eup %2160 }
0x128d   :  { %1373 = vrot.lane.b32.xlu0 %v2161_v35, %s2176_s21 }
0x1290   :  { %v2163_v36 = vpop.eup %2162 }
0x1291   :  { %1469 = vrot.lane.b32.xlu1 %v2163_v36, %s2176_s21 }
0x12ff   :  { %v1374_v37 = vpop.permute.xlu0 %1373 }
0x1300   :  { %v1376_v38 = vmul.f32 %v1374_v37, %v1359_v20 }
0x1302   :  { %1475 = vrot.lane.b32.xlu0 %v1376_v38, %s2175_s1 }
0x1303   :  { %v1470_v39 = vpop.permute.xlu1 %1469 }
0x1304   :  { %v1472_v40 = vmul.f32 %v1470_v39, %v1455_v24 }
0x1306   :  { %1477 = vrot.lane.b32.xlu1 %v1472_v40, %s2175_s1 }
0x1374   :  { %v1476_v41 = vpop.permute.xlu0 %1475 }
0x1375   :  { %1742 = vst.msk [vmem:[%s2589_s2 + $0x60] sm:$0xff] %vm15_vm0, %v1476_v41  ;;  %1993 = vmatmul.mubr.msk.f32.vlgmr.msra.gmra.mrb[14].mxu0 %vm15_vm0, %v1476_v41 }
0x1378   :  { %v1478_v42 = vpop.permute.xlu1 %1477 }
0x1379   :  { %1743 = vst.msk [vmem:[%s2589_s2 + $0x68] sm:$0xff] %vm15_vm0, %v1478_v42  ;;  %2004 = vmatmul.mubr.msk.f32.vlgmr.msra.gmra.mrb[14].mxu1 %vm15_vm0, %v1478_v42 }
0x1448   :  { %v1555_v44 = vpop.f32.mrb[14].mxu0 }
0x1449   :  { %v1559_v45 = vadd.f32 %v1744_v43, %v1555_v44  ;;  %v1994_v46 = vpop.f32.mrb[15].mxu0 }
0x144b   :  { %v1560_v48 = vmul.f32 0.5, %v1559_v45 }
0x144c   :  { %v1651_v49 = vpop.f32.mrb[14].mxu1 }
0x144d   :  { %v1561_v50 = vsel %vm2253_vm4, %v1559_v45, %v1560_v48  ;;  %v1655_v51 = vadd.f32 %v1745_v47, %v1651_v49  ;;  %v2005_v52 = vpop.f32.mrb[15].mxu1 }
0x144e   :  { %2164 = vtanh.f32 %v1561_v50 }
0x144f   :  { %v1656_v53 = vmul.f32 0.5, %v1655_v51 }
0x1451   :  { %v1657_v54 = vsel %vm2253_vm4, %v1655_v51, %v1656_v53 }
0x1452   :  { %2166 = vtanh.f32 %v1657_v54 }
0x1458   :  { %v2165_v55 = vpop.eup %2164 }
0x1459   :  { %v1563_v56 = vadd.f32 1.0, %v2165_v55 }
0x145b   :  { %v1564_v57 = vmul.f32 0.5, %v1563_v56 }
0x145c   :  { %v2167_v58 = vpop.eup %2166 }
0x145d   :  { %v1565_v59 = vsel %vm2253_vm4, %v2165_v55, %v1564_v57  ;;  %v1659_v60 = vadd.f32 1.0, %v2167_v58 }
0x145e   :  { %1568 = vrot.lane.b32.xlu0 %v1565_v59, %s2176_s21  ;;  %v1566_v6 = vmul.f32 %v1565_v59, %v1370_v31 }
0x145f   :  { %v1660_v61 = vmul.f32 0.5, %v1659_v60 }
0x1461   :  { %v1661_v62 = vsel %vm2253_vm4, %v2167_v58, %v1660_v61 }
0x1462   :  { %1664 = vrot.lane.b32.xlu1 %v1661_v62, %s2176_s21  ;;  %v1662_v10 = vmul.f32 %v1661_v62, %v1466_v34 }
0x14d0   :  { %v1569_v63 = vpop.permute.xlu0 %1568 }
0x14d1   :  { %v1571_v1 = vmul.f32 %v1569_v63, %v1565_v59 }
0x14d3   :  { %1573 = vrot.lane.b32.xlu0 %v1571_v1, %s2175_s1 }
0x14d4   :  { %v1665_v2 = vpop.permute.xlu1 %1664 }
0x14d5   :  { %v1667_v3 = vmul.f32 %v1665_v2, %v1661_v62 }
0x14d7   :  { %1669 = vrot.lane.b32.xlu1 %v1667_v3, %s2175_s1 }
0x1545   :  { %v1574_v8 = vpop.permute.xlu0 %1573 }
0x1546   :  { %v1576_v9 = vadd.f32 %v1574_v8, %v1566_v6 }
0x1548   :  { %2168 = vtanh.f32 %v1576_v9 }
0x1549   :  { %v1670_v11 = vpop.permute.xlu1 %1669 }
0x154a   :  { %v1672_v12 = vadd.f32 %v1670_v11, %v1662_v10 }
0x154c   :  { %2170 = vtanh.f32 %v1672_v12 }
0x1552   :  { %v2169_v22 = vpop.eup %2168 }
0x1553   :  { %1579 = vrot.lane.b32.xlu0 %v2169_v22, %s2176_s21 }
0x1556   :  { %v2171_v13 = vpop.eup %2170 }
0x1557   :  { %1675 = vrot.lane.b32.xlu1 %v2171_v13, %s2176_s21 }
0x15c5   :  { %v1580_v5 = vpop.permute.xlu0 %1579 }
0x15c6   :  { %v1582_v0 = vmul.f32 %v1580_v5, %v1565_v59 }
0x15c8   :  { %1681 = vrot.lane.b32.xlu0 %v1582_v0, %s2175_s1 }
0x15c9   :  { %v1676_v14 = vpop.permute.xlu1 %1675 }
0x15ca   :  { %v1678_v4 = vmul.f32 %v1676_v14, %v1661_v62 }
0x15cc   :  { %1683 = vrot.lane.b32.xlu1 %v1678_v4, %s2175_s1  ;;  %1694 = vrot.lane.b32.xlu0 %v1576_v9, %s2177_s0 }
0x15d0   :  { %1696 = vrot.lane.b32.xlu1 %v1672_v12, %s2177_s0 }
0x163a   :  { %v1682_v7 = vpop.permute.xlu0 %1681 }
0x163b   :  { %1748 = vst.msk [vmem:[%s2589_s2 + $0x70] sm:$0xff] %vm15_vm0, %v1682_v7  ;;  %1690 = vst.msk [vmem:[#allocation2] sm:$0xff] %vm15_vm0, %v1682_v7 }
0x163e   :  { %v1684_v15 = vpop.permute.xlu1 %1683  ;;  %v1695_v16 = vpop.permute.xlu0 %1694 }
0x163f   :  { %1749 = vst.msk [vmem:[%s2589_s2 + $0x78] sm:$0xff] %vm15_vm0, %v1684_v15  ;;  %1691 = vst.msk [vmem:[#allocation2 + $0x8] sm:$0xff] %vm15_vm0, %v1684_v15 }
0x1640   :  { %1700 = vst.msk [vmem:[#allocation3] sm:$0xff] %vm15_vm0, %v1695_v16 }
0x1642   :  { %v1697_v17 = vpop.permute.xlu1 %1696 }
0x1643   :  { %1701 = vst.msk [vmem:[#allocation3 + $0x8] sm:$0xff] %vm15_vm0, %v1697_v17 }

</bundles_post_ra>
